<compile_context>
chip_gen: v6e
topology: v6e:2x2x1
jax: 0.10.0
libtpu: 0.0.40
codegen_flags: <defaults>
</compile_context>

<pallas_src>
from functools import partial

import jax
import jax.numpy as jnp
from jax.experimental import pallas as pl
from jax.experimental.pallas import tpu as pltpu


def _flownet_kernel(x_ref, w1_ref, b1_ref, w2_ref, b2_ref, w3s_ref, b3s_ref,
                    w3t_ref, b3t_ref, p11_ref, p21_ref, p12_ref, p22_ref,
                    out_ref, logdet_ref, *, nblocks, half):
    f32, bf16 = jnp.float32, jnp.bfloat16

    def mxu(a, b):  # bf16 operands, f32 accumulate (MXU-native on all generations)
        return jnp.dot(a, b, preferred_element_type=f32)

    # Carry the two channel halves separately across blocks (u = kept half, v = coupled
    # half): no per-block concat / slice at the non-128-aligned lane offset `half`.
    u = x_ref[:, :half].astype(f32)
    v = x_ref[:, half:].astype(f32)

    for i in range(nblocks):                       # static unroll; per-block weights
        if i == 0:
            z1, z2 = u, v
        else:
            # Permutation of the previous block's output, folded into the MXU as four
            # half-sized 0/1 quadrant matmuls (exact in bf16):
            #   (h @ P)[:, j] == h[:, perm[j]]  with  P[perm[j], j] = 1.
            ub, vb = u.astype(bf16), v.astype(bf16)
            z1 = mxu(ub, p11_ref[i - 1]) + mxu(vb, p21_ref[i - 1])
            z2 = mxu(ub, p12_ref[i - 1]) + mxu(vb, p22_ref[i - 1])

        # net(z1): Linear -> ReLU -> Linear -> ReLU -> Linear, with the Scale module
        # folded into w3/b3 on the host and the last Linear split into log_s / t halves.
        a = jnp.maximum(mxu(z1.astype(bf16), w1_ref[i]) + b1_ref[i], 0.0)
        a = jnp.maximum(mxu(a.astype(bf16), w2_ref[i]) + b2_ref[i], 0.0)
        ab = a.astype(bf16)
        log_s = mxu(ab, w3s_ref[i]) + b3s_ref[i]
        t = mxu(ab, w3t_ref[i]) + b3t_ref[i]

        # sigmoid and its log share a single EUP exp.  (Exact divide is kept -- the VPU
        # slot is idle in this MXU-launch-latency-bound kernel -- so the kernel stays
        # within tight tolerance of the reference.)
        e = jnp.exp(-(log_s + 2.0))
        s = 1.0 / (1.0 + e)
        v = (z2 + t) * s
        u = z1

        # Lane-dense logdet write: one full batch-major row of the (nblocks, N) output
        # per block (no width-nblocks masked store, no width-1 column concat).
        logdet_ref[i, :] = -jnp.sum(jnp.log(1.0 + e), axis=1)

    # Write the result halves exactly once at the end.
    out_ref[:, :half] = u.astype(out_ref.dtype)
    out_ref[:, half:] = v.astype(out_ref.dtype)


def _full_spec(shape):
    ndim = len(shape)
    return pl.BlockSpec(shape, lambda i: (0,) * ndim)


def _pick_batch_tiling(N, nz, hidden):
    """Pick (batch_tile, padded_batch) so that
       * (tb, nz) x/out blocks and the (nblocks, tb) logdet block are legal & lane-dense
         (tb is a multiple of 128 whenever the batch is tiled),
       * >= 2 grid steps exist when the batch allows it (v7x has 2 TensorCores),
       * per-step VMEM stays far below the 32 MiB scoped default (64 MiB total on v7x)."""
    # Rough f32 bytes per batch row resident per step: double-buffered x/out blocks plus
    # the f32 intermediates of the unrolled block body.
    row_bytes = 4 * (4 * nz + 2 * hidden + 4 * nz)
    budget = 8 << 20
    cap = max(128, min(2048, ((budget // row_bytes) // 128) * 128))
    # Exact-fit, lane-dense tiling with >= 2 grid steps.
    for tb in (2048, 1024, 512, 256, 128):
        if tb <= cap and N % tb == 0 and N // tb >= 2:
            return tb, N
    if N <= 256:
        # Tiny batch: a single 8-sublane-aligned tile (grid of 1 is unavoidable here).
        npad = ((N + 7) // 8) * 8
        return npad, npad
    # Awkward batch: pad to a multiple of 128 and split into >= 2 VMEM-bounded tiles.
    np128 = ((N + 127) // 128) * 128
    for tb in (2048, 1024, 512, 256, 128):
        if tb <= cap and np128 % tb == 0 and np128 // tb >= 2:
            return tb, np128
    return 128, np128


def flownet_forward(x, params, perms):
    """x: (N, nz). params: dict of per-block stacked f32 weights. perms: list of (nz,) ints."""
    N, nz = x.shape
    nblocks = params["w1"].shape[0]
    hidden = params["w1"].shape[2]
    half = nz // 2
    f32, bf16 = jnp.float32, jnp.bfloat16

    # Fold Scale (exp(scale * 3)) into the last Linear and split its log_s / t halves.
    es = jnp.exp(params["scale"].astype(f32) * 3.0)          # (nblocks, 1, nz)
    w3e = params["w3"].astype(f32) * es
    b3e = params["b3"].astype(f32) * es
    w1 = params["w1"].astype(bf16)
    w2 = params["w2"].astype(bf16)
    w3s, w3t = w3e[:, :, :half].astype(bf16), w3e[:, :, half:].astype(bf16)
    b1, b2 = params["b1"].astype(f32), params["b2"].astype(f32)
    b3s, b3t = b3e[:, :, :half], b3e[:, :, half:]

    # Permutation matrices with P[perm[j], j] = 1 so that (h @ P)[:, j] == h[:, perm[j]],
    # pre-split into half-sized quadrants (0/1 is exact in bf16).
    if nblocks > 1:
        pmats = jnp.stack([jax.nn.one_hot(p, nz, dtype=f32).T for p in perms], axis=0)
    else:
        pmats = jnp.eye(nz, dtype=f32)[None]                  # dummy, never indexed
    p11 = pmats[:, :half, :half].astype(bf16)
    p21 = pmats[:, half:, :half].astype(bf16)
    p12 = pmats[:, :half, half:].astype(bf16)
    p22 = pmats[:, half:, half:].astype(bf16)

    tb, Np = _pick_batch_tiling(N, nz, hidden)
    xp = x if Np == N else jnp.pad(x, ((0, Np - N), (0, 0)))
    grid = (Np // tb,)

    kernel = partial(_flownet_kernel, nblocks=nblocks, half=half)
    out, logdet_t = pl.pallas_call(
        kernel,
        out_shape=(
            jax.ShapeDtypeStruct((Np, nz), x.dtype),
            jax.ShapeDtypeStruct((nblocks, Np), jnp.float32),   # batch-major (lane-dense)
        ),
        grid_spec=pltpu.PrefetchScalarGridSpec(
            num_scalar_prefetch=0,
            grid=grid,
            in_specs=[
                pl.BlockSpec((tb, nz), lambda i: (i, 0)),
                _full_spec(w1.shape), _full_spec(b1.shape),
                _full_spec(w2.shape), _full_spec(b2.shape),
                _full_spec(w3s.shape), _full_spec(b3s.shape),
                _full_spec(w3t.shape), _full_spec(b3t.shape),
                _full_spec(p11.shape), _full_spec(p21.shape),
                _full_spec(p12.shape), _full_spec(p22.shape),
            ],
            out_specs=[
                pl.BlockSpec((tb, nz), lambda i: (i, 0)),
                pl.BlockSpec((nblocks, tb), lambda i: (0, i)),
            ],
        ),
        compiler_params=pltpu.CompilerParams(
            dimension_semantics=("parallel",),
        ),
    )(xp, w1, b1, w2, b2, w3s, b3s, w3t, b3t, p11, p21, p12, p22)

    return out[:N], logdet_t.T[:N]


def flownet_reference(x, params, perms):
    """Plain-JAX reference with the exact PyTorch FlowNet.forward structure.

    The matmul operands are cast to bf16 to mirror the kernel's explicit MXU-feeding
    policy (the single intentional numeric deviation from the f32 torch module);
    accumulation stays in f32.  The permutation is applied by exact indexing.
    """
    def mxu(a, b):
        return jnp.dot(a.astype(jnp.bfloat16), b.astype(jnp.bfloat16),
                       preferred_element_type=jnp.float32)

    nblocks = params["w1"].shape[0]
    half = x.shape[1] // 2
    h = x.astype(jnp.float32)
    logdets = []
    for i in range(nblocks):
        z1, z2 = h[:, :half], h[:, half:]
        a = jnp.maximum(mxu(z1, params["w1"][i]) + params["b1"][i], 0.0)
        a = jnp.maximum(mxu(a, params["w2"][i]) + params["b2"][i], 0.0)
        a = (mxu(a, params["w3"][i]) + params["b3"][i]) * jnp.exp(params["scale"][i] * 3.0)
        log_s, t = a[:, :half], a[:, half:]
        s = jax.nn.sigmoid(log_s + 2.0)
        y2 = (z2 + t) * s
        h = jnp.concatenate([z1, y2], axis=1)
        logdets.append(jnp.sum(jnp.log(s), axis=1))
        if i < nblocks - 1:
            h = h[:, perms[i]]                                  # torch: x[:, perm]
    return h, jnp.stack(logdets, axis=1)


if __name__ == "__main__":
    key = jax.random.PRNGKey(0)
    keys = jax.random.split(key, 10)

    # Small shapes consistent with the module: x is (batch, nz), nz % 4 == 0.
    N, nz, hidden, nblocks = 8, 32, 32, 4
    half = nz // 2

    def init(k, shape, scale):
        return (scale * jax.random.normal(k, shape, jnp.float32)).astype(jnp.float32)

    params = {
        "w1": init(keys[1], (nblocks, half, hidden), half ** -0.5),
        "b1": init(keys[2], (nblocks, 1, hidden), 0.1),
        "w2": init(keys[3], (nblocks, hidden, hidden), hidden ** -0.5),
        "b2": init(keys[4], (nblocks, 1, hidden), 0.1),
        "w3": init(keys[5], (nblocks, hidden, nz), hidden ** -0.5),
        "b3": init(keys[6], (nblocks, 1, nz), 0.1),
        # torch zero-inits Scale (exp(0)=1); small random values exercise the path.
        "scale": init(keys[7], (nblocks, 1, nz), 0.1),
    }
    perm_keys = jax.random.split(keys[8], max(nblocks - 1, 1))
    perms = [jax.random.permutation(perm_keys[i], nz).astype(jnp.int32)
             for i in range(nblocks - 1)]

    x = jax.random.normal(keys[0], (N, nz), jnp.float32)

    out, logdets = flownet_forward(x, params, perms)
    out = jax.block_until_ready(out)
    logdets = jax.block_until_ready(logdets)

    ref_out, ref_logdets = flownet_reference(x, params, perms)
    assert out.shape == (N, nz) and logdets.shape == (N, nblocks)
    # Tolerance covers the residual bf16-vs-f32 rounding of carried activations through
    # the (exact 0/1) bf16 permutation matmuls and the host-side Scale fold; any
    # structural error (permutation / coupling / bias) would be O(0.1 - 1).
    assert bool(jnp.allclose(out, ref_out, rtol=3e-2, atol=3e-2))
    assert bool(jnp.allclose(logdets, ref_logdets, rtol=3e-2, atol=3e-2))

    print("KERNEL_OK")
</pallas_src>

<mosaic_0001>
module attributes {stable_mosaic.version = 11 : i64} {
  func.func @_flownet_kernel(%arg0: i32, %arg1: memref<8x32xf32, #tpu.memory_space<vmem>>, %arg2: memref<4x16x32xbf16, #tpu.memory_space<vmem>>, %arg3: memref<4x1x32xf32, #tpu.memory_space<vmem>>, %arg4: memref<4x32x32xbf16, #tpu.memory_space<vmem>>, %arg5: memref<4x1x32xf32, #tpu.memory_space<vmem>>, %arg6: memref<4x32x16xbf16, #tpu.memory_space<vmem>>, %arg7: memref<4x1x16xf32, #tpu.memory_space<vmem>>, %arg8: memref<4x32x16xbf16, #tpu.memory_space<vmem>>, %arg9: memref<4x1x16xf32, #tpu.memory_space<vmem>>, %arg10: memref<3x16x16xbf16, #tpu.memory_space<vmem>>, %arg11: memref<3x16x16xbf16, #tpu.memory_space<vmem>>, %arg12: memref<3x16x16xbf16, #tpu.memory_space<vmem>>, %arg13: memref<3x16x16xbf16, #tpu.memory_space<vmem>>, %arg14: memref<8x32xf32, #tpu.memory_space<vmem>>, %arg15: memref<4x8xf32, #tpu.memory_space<vmem>>) attributes {dimension_semantics = [#tpu.dimension_semantics<parallel>], iteration_bounds = array<i64: 1>, scalar_prefetch = 0 : i64, scratch_operands = 0 : i64, tpu.core_type = #tpu.core_type<tc>, window_params = [{transform_indices = @transform_0, window_bounds = array<i64: 8, 32>}, {pipeline_mode = #tpu.pipeline_mode<synchronous>, transform_indices = @transform_1, window_bounds = array<i64: 4, 16, 32>}, {pipeline_mode = #tpu.pipeline_mode<synchronous>, transform_indices = @transform_2, window_bounds = array<i64: 4, 1, 32>}, {pipeline_mode = #tpu.pipeline_mode<synchronous>, transform_indices = @transform_3, window_bounds = array<i64: 4, 32, 32>}, {pipeline_mode = #tpu.pipeline_mode<synchronous>, transform_indices = @transform_4, window_bounds = array<i64: 4, 1, 32>}, {pipeline_mode = #tpu.pipeline_mode<synchronous>, transform_indices = @transform_5, window_bounds = array<i64: 4, 32, 16>}, {pipeline_mode = #tpu.pipeline_mode<synchronous>, transform_indices = @transform_6, window_bounds = array<i64: 4, 1, 16>}, {pipeline_mode = #tpu.pipeline_mode<synchronous>, transform_indices = @transform_7, window_bounds = array<i64: 4, 32, 16>}, {pipeline_mode = #tpu.pipeline_mode<synchronous>, transform_indices = @transform_8, window_bounds = array<i64: 4, 1, 16>}, {pipeline_mode = #tpu.pipeline_mode<synchronous>, transform_indices = @transform_9, window_bounds = array<i64: 3, 16, 16>}, {pipeline_mode = #tpu.pipeline_mode<synchronous>, transform_indices = @transform_10, window_bounds = array<i64: 3, 16, 16>}, {pipeline_mode = #tpu.pipeline_mode<synchronous>, transform_indices = @transform_11, window_bounds = array<i64: 3, 16, 16>}, {pipeline_mode = #tpu.pipeline_mode<synchronous>, transform_indices = @transform_12, window_bounds = array<i64: 3, 16, 16>}, {transform_indices = @transform_13, window_bounds = array<i64: 8, 32>}, {transform_indices = @transform_14, window_bounds = array<i64: 4, 8>}]} {
    %c0 = arith.constant 0 : index
    %c0_0 = arith.constant 0 : index
    %0 = vector.load %arg1[%c0, %c0_0] : memref<8x32xf32, #tpu.memory_space<vmem>>, vector<8x16xf32>
    %c0_1 = arith.constant 0 : index
    %c16 = arith.constant 16 : index
    %1 = vector.load %arg1[%c0_1, %c16] : memref<8x32xf32, #tpu.memory_space<vmem>>, vector<8x16xf32>
    %2 = arith.truncf %0 : vector<8x16xf32> to vector<8x16xbf16>
    %c0_2 = arith.constant 0 : index
    %c0_3 = arith.constant 0 : index
    %c0_4 = arith.constant 0 : index
    %3 = vector.load %arg2[%c0_2, %c0_3, %c0_4] : memref<4x16x32xbf16, #tpu.memory_space<vmem>>, vector<1x16x32xbf16>
    %4 = vector.shape_cast %3 : vector<1x16x32xbf16> to vector<16x32xbf16>
    %cst = arith.constant dense<0.000000e+00> : vector<8x32xf32>
    %5 = tpu.matmul %2, %4, %cst {dimension_numbers = #tpu.dot_dimension_numbers<[1], [0], [0], [1], [0, 0, 1, 1], [], []>} : vector<8x16xbf16>, vector<16x32xbf16>, vector<8x32xf32> -> vector<8x32xf32>
    %c0_5 = arith.constant 0 : index
    %c0_6 = arith.constant 0 : index
    %c0_7 = arith.constant 0 : index
    %6 = vector.load %arg3[%c0_5, %c0_6, %c0_7] : memref<4x1x32xf32, #tpu.memory_space<vmem>>, vector<1x1x32xf32>
    %7 = vector.shape_cast %6 : vector<1x1x32xf32> to vector<1x32xf32>
    %8 = vector.broadcast %7 : vector<1x32xf32> to vector<8x32xf32>
    %9 = arith.addf %5, %8 : vector<8x32xf32>
    %cst_8 = arith.constant 0.000000e+00 : f32
    %10 = vector.broadcast %cst_8 : f32 to vector<8x32xf32>
    %11 = arith.maximumf %9, %10 : vector<8x32xf32>
    %12 = arith.truncf %11 : vector<8x32xf32> to vector<8x32xbf16>
    %c0_9 = arith.constant 0 : index
    %c0_10 = arith.constant 0 : index
    %c0_11 = arith.constant 0 : index
    %13 = vector.load %arg4[%c0_9, %c0_10, %c0_11] : memref<4x32x32xbf16, #tpu.memory_space<vmem>>, vector<1x32x32xbf16>
    %14 = vector.shape_cast %13 : vector<1x32x32xbf16> to vector<32x32xbf16>
    %cst_12 = arith.constant dense<0.000000e+00> : vector<8x32xf32>
    %15 = tpu.matmul %12, %14, %cst_12 {dimension_numbers = #tpu.dot_dimension_numbers<[1], [0], [0], [1], [0, 0, 1, 1], [], []>} : vector<8x32xbf16>, vector<32x32xbf16>, vector<8x32xf32> -> vector<8x32xf32>
    %c0_13 = arith.constant 0 : index
    %c0_14 = arith.constant 0 : index
    %c0_15 = arith.constant 0 : index
    %16 = vector.load %arg5[%c0_13, %c0_14, %c0_15] : memref<4x1x32xf32, #tpu.memory_space<vmem>>, vector<1x1x32xf32>
    %17 = vector.shape_cast %16 : vector<1x1x32xf32> to vector<1x32xf32>
    %18 = vector.broadcast %17 : vector<1x32xf32> to vector<8x32xf32>
    %19 = arith.addf %15, %18 : vector<8x32xf32>
    %cst_16 = arith.constant 0.000000e+00 : f32
    %20 = vector.broadcast %cst_16 : f32 to vector<8x32xf32>
    %21 = arith.maximumf %19, %20 : vector<8x32xf32>
    %22 = arith.truncf %21 : vector<8x32xf32> to vector<8x32xbf16>
    %c0_17 = arith.constant 0 : index
    %c0_18 = arith.constant 0 : index
    %c0_19 = arith.constant 0 : index
    %23 = vector.load %arg6[%c0_17, %c0_18, %c0_19] : memref<4x32x16xbf16, #tpu.memory_space<vmem>>, vector<1x32x16xbf16>
    %24 = vector.shape_cast %23 : vector<1x32x16xbf16> to vector<32x16xbf16>
    %cst_20 = arith.constant dense<0.000000e+00> : vector<8x16xf32>
    %25 = tpu.matmul %22, %24, %cst_20 {dimension_numbers = #tpu.dot_dimension_numbers<[1], [0], [0], [1], [0, 0, 1, 1], [], []>} : vector<8x32xbf16>, vector<32x16xbf16>, vector<8x16xf32> -> vector<8x16xf32>
    %c0_21 = arith.constant 0 : index
    %c0_22 = arith.constant 0 : index
    %c0_23 = arith.constant 0 : index
    %26 = vector.load %arg7[%c0_21, %c0_22, %c0_23] : memref<4x1x16xf32, #tpu.memory_space<vmem>>, vector<1x1x16xf32>
    %27 = vector.shape_cast %26 : vector<1x1x16xf32> to vector<1x16xf32>
    %28 = vector.broadcast %27 : vector<1x16xf32> to vector<8x16xf32>
    %29 = arith.addf %25, %28 : vector<8x16xf32>
    %c0_24 = arith.constant 0 : index
    %c0_25 = arith.constant 0 : index
    %c0_26 = arith.constant 0 : index
    %30 = vector.load %arg8[%c0_24, %c0_25, %c0_26] : memref<4x32x16xbf16, #tpu.memory_space<vmem>>, vector<1x32x16xbf16>
    %31 = vector.shape_cast %30 : vector<1x32x16xbf16> to vector<32x16xbf16>
    %cst_27 = arith.constant dense<0.000000e+00> : vector<8x16xf32>
    %32 = tpu.matmul %22, %31, %cst_27 {dimension_numbers = #tpu.dot_dimension_numbers<[1], [0], [0], [1], [0, 0, 1, 1], [], []>} : vector<8x32xbf16>, vector<32x16xbf16>, vector<8x16xf32> -> vector<8x16xf32>
    %c0_28 = arith.constant 0 : index
    %c0_29 = arith.constant 0 : index
    %c0_30 = arith.constant 0 : index
    %33 = vector.load %arg9[%c0_28, %c0_29, %c0_30] : memref<4x1x16xf32, #tpu.memory_space<vmem>>, vector<1x1x16xf32>
    %34 = vector.shape_cast %33 : vector<1x1x16xf32> to vector<1x16xf32>
    %35 = vector.broadcast %34 : vector<1x16xf32> to vector<8x16xf32>
    %36 = arith.addf %32, %35 : vector<8x16xf32>
    %cst_31 = arith.constant 2.000000e+00 : f32
    %37 = vector.broadcast %cst_31 : f32 to vector<8x16xf32>
    %38 = arith.addf %29, %37 : vector<8x16xf32>
    %cst_32 = arith.constant 0.000000e+00 : f32
    %39 = vector.broadcast %cst_32 : f32 to vector<8x16xf32>
    %40 = arith.subf %39, %38 : vector<8x16xf32>
    %41 = math.exp %40 : vector<8x16xf32>
    %cst_33 = arith.constant 1.000000e+00 : f32
    %42 = vector.broadcast %cst_33 : f32 to vector<8x16xf32>
    %43 = arith.addf %42, %41 : vector<8x16xf32>
    %cst_34 = arith.constant 1.000000e+00 : f32
    %44 = vector.broadcast %cst_34 : f32 to vector<8x16xf32>
    %45 = arith.divf %44, %43 : vector<8x16xf32>
    %46 = arith.addf %1, %36 : vector<8x16xf32>
    %47 = arith.mulf %46, %45 : vector<8x16xf32>
    %cst_35 = arith.constant 1.000000e+00 : f32
    %48 = vector.broadcast %cst_35 : f32 to vector<8x16xf32>
    %49 = arith.addf %48, %41 : vector<8x16xf32>
    %50 = math.log %49 : vector<8x16xf32>
    %cst_36 = arith.constant dense<0.000000e+00> : vector<8xf32>
    %51 = vector.multi_reduction <add>, %50, %cst_36 [1] : vector<8x16xf32> to vector<8xf32>
    %cst_37 = arith.constant 0.000000e+00 : f32
    %52 = vector.broadcast %cst_37 : f32 to vector<8xf32>
    %53 = arith.subf %52, %51 : vector<8xf32>
    %c0_38 = arith.constant 0 : index
    %c0_39 = arith.constant 0 : index
    %54 = vector.load %arg15[%c0_38, %c0_39] : memref<4x8xf32, #tpu.memory_space<vmem>>, vector<1x8xf32>
    %55 = vector.shape_cast %54 : vector<1x8xf32> to vector<8xf32>
    %56 = vector.shape_cast %53 : vector<8xf32> to vector<1x8xf32>
    tpu.vector_store %arg15[%c0_38, %c0_39], %56 {strides = array<i32>} : memref<4x8xf32, #tpu.memory_space<vmem>>, vector<1x8xf32>,
    %57 = arith.truncf %0 : vector<8x16xf32> to vector<8x16xbf16>
    %58 = arith.truncf %47 : vector<8x16xf32> to vector<8x16xbf16>
    %c0_40 = arith.constant 0 : index
    %c0_41 = arith.constant 0 : index
    %c0_42 = arith.constant 0 : index
    %59 = vector.load %arg10[%c0_40, %c0_41, %c0_42] : memref<3x16x16xbf16, #tpu.memory_space<vmem>>, vector<1x16x16xbf16>
    %60 = vector.shape_cast %59 : vector<1x16x16xbf16> to vector<16x16xbf16>
    %cst_43 = arith.constant dense<0.000000e+00> : vector<8x16xf32>
    %61 = tpu.matmul %57, %60, %cst_43 {dimension_numbers = #tpu.dot_dimension_numbers<[1], [0], [0], [1], [0, 0, 1, 1], [], []>} : vector<8x16xbf16>, vector<16x16xbf16>, vector<8x16xf32> -> vector<8x16xf32>
    %c0_44 = arith.constant 0 : index
    %c0_45 = arith.constant 0 : index
    %c0_46 = arith.constant 0 : index
    %62 = vector.load %arg11[%c0_44, %c0_45, %c0_46] : memref<3x16x16xbf16, #tpu.memory_space<vmem>>, vector<1x16x16xbf16>
    %63 = vector.shape_cast %62 : vector<1x16x16xbf16> to vector<16x16xbf16>
    %cst_47 = arith.constant dense<0.000000e+00> : vector<8x16xf32>
    %64 = tpu.matmul %58, %63, %cst_47 {dimension_numbers = #tpu.dot_dimension_numbers<[1], [0], [0], [1], [0, 0, 1, 1], [], []>} : vector<8x16xbf16>, vector<16x16xbf16>, vector<8x16xf32> -> vector<8x16xf32>
    %65 = arith.addf %61, %64 : vector<8x16xf32>
    %c0_48 = arith.constant 0 : index
    %c0_49 = arith.constant 0 : index
    %c0_50 = arith.constant 0 : index
    %66 = vector.load %arg12[%c0_48, %c0_49, %c0_50] : memref<3x16x16xbf16, #tpu.memory_space<vmem>>, vector<1x16x16xbf16>
    %67 = vector.shape_cast %66 : vector<1x16x16xbf16> to vector<16x16xbf16>
    %cst_51 = arith.constant dense<0.000000e+00> : vector<8x16xf32>
    %68 = tpu.matmul %57, %67, %cst_51 {dimension_numbers = #tpu.dot_dimension_numbers<[1], [0], [0], [1], [0, 0, 1, 1], [], []>} : vector<8x16xbf16>, vector<16x16xbf16>, vector<8x16xf32> -> vector<8x16xf32>
    %c0_52 = arith.constant 0 : index
    %c0_53 = arith.constant 0 : index
    %c0_54 = arith.constant 0 : index
    %69 = vector.load %arg13[%c0_52, %c0_53, %c0_54] : memref<3x16x16xbf16, #tpu.memory_space<vmem>>, vector<1x16x16xbf16>
    %70 = vector.shape_cast %69 : vector<1x16x16xbf16> to vector<16x16xbf16>
    %cst_55 = arith.constant dense<0.000000e+00> : vector<8x16xf32>
    %71 = tpu.matmul %58, %70, %cst_55 {dimension_numbers = #tpu.dot_dimension_numbers<[1], [0], [0], [1], [0, 0, 1, 1], [], []>} : vector<8x16xbf16>, vector<16x16xbf16>, vector<8x16xf32> -> vector<8x16xf32>
    %72 = arith.addf %68, %71 : vector<8x16xf32>
    %73 = arith.truncf %65 : vector<8x16xf32> to vector<8x16xbf16>
    %c1 = arith.constant 1 : index
    %c0_56 = arith.constant 0 : index
    %c0_57 = arith.constant 0 : index
    %74 = vector.load %arg2[%c1, %c0_56, %c0_57] : memref<4x16x32xbf16, #tpu.memory_space<vmem>>, vector<1x16x32xbf16>
    %75 = vector.shape_cast %74 : vector<1x16x32xbf16> to vector<16x32xbf16>
    %cst_58 = arith.constant dense<0.000000e+00> : vector<8x32xf32>
    %76 = tpu.matmul %73, %75, %cst_58 {dimension_numbers = #tpu.dot_dimension_numbers<[1], [0], [0], [1], [0, 0, 1, 1], [], []>} : vector<8x16xbf16>, vector<16x32xbf16>, vector<8x32xf32> -> vector<8x32xf32>
    %c1_59 = arith.constant 1 : index
    %c0_60 = arith.constant 0 : index
    %c0_61 = arith.constant 0 : index
    %77 = vector.load %arg3[%c1_59, %c0_60, %c0_61] : memref<4x1x32xf32, #tpu.memory_space<vmem>>, vector<1x1x32xf32>
    %78 = vector.shape_cast %77 : vector<1x1x32xf32> to vector<1x32xf32>
    %79 = vector.broadcast %78 : vector<1x32xf32> to vector<8x32xf32>
    %80 = arith.addf %76, %79 : vector<8x32xf32>
    %cst_62 = arith.constant 0.000000e+00 : f32
    %81 = vector.broadcast %cst_62 : f32 to vector<8x32xf32>
    %82 = arith.maximumf %80, %81 : vector<8x32xf32>
    %83 = arith.truncf %82 : vector<8x32xf32> to vector<8x32xbf16>
    %c1_63 = arith.constant 1 : index
    %c0_64 = arith.constant 0 : index
    %c0_65 = arith.constant 0 : index
    %84 = vector.load %arg4[%c1_63, %c0_64, %c0_65] : memref<4x32x32xbf16, #tpu.memory_space<vmem>>, vector<1x32x32xbf16>
    %85 = vector.shape_cast %84 : vector<1x32x32xbf16> to vector<32x32xbf16>
    %cst_66 = arith.constant dense<0.000000e+00> : vector<8x32xf32>
    %86 = tpu.matmul %83, %85, %cst_66 {dimension_numbers = #tpu.dot_dimension_numbers<[1], [0], [0], [1], [0, 0, 1, 1], [], []>} : vector<8x32xbf16>, vector<32x32xbf16>, vector<8x32xf32> -> vector<8x32xf32>
    %c1_67 = arith.constant 1 : index
    %c0_68 = arith.constant 0 : index
    %c0_69 = arith.constant 0 : index
    %87 = vector.load %arg5[%c1_67, %c0_68, %c0_69] : memref<4x1x32xf32, #tpu.memory_space<vmem>>, vector<1x1x32xf32>
    %88 = vector.shape_cast %87 : vector<1x1x32xf32> to vector<1x32xf32>
    %89 = vector.broadcast %88 : vector<1x32xf32> to vector<8x32xf32>
    %90 = arith.addf %86, %89 : vector<8x32xf32>
    %cst_70 = arith.constant 0.000000e+00 : f32
    %91 = vector.broadcast %cst_70 : f32 to vector<8x32xf32>
    %92 = arith.maximumf %90, %91 : vector<8x32xf32>
    %93 = arith.truncf %92 : vector<8x32xf32> to vector<8x32xbf16>
    %c1_71 = arith.constant 1 : index
    %c0_72 = arith.constant 0 : index
    %c0_73 = arith.constant 0 : index
    %94 = vector.load %arg6[%c1_71, %c0_72, %c0_73] : memref<4x32x16xbf16, #tpu.memory_space<vmem>>, vector<1x32x16xbf16>
    %95 = vector.shape_cast %94 : vector<1x32x16xbf16> to vector<32x16xbf16>
    %cst_74 = arith.constant dense<0.000000e+00> : vector<8x16xf32>
    %96 = tpu.matmul %93, %95, %cst_74 {dimension_numbers = #tpu.dot_dimension_numbers<[1], [0], [0], [1], [0, 0, 1, 1], [], []>} : vector<8x32xbf16>, vector<32x16xbf16>, vector<8x16xf32> -> vector<8x16xf32>
    %c1_75 = arith.constant 1 : index
    %c0_76 = arith.constant 0 : index
    %c0_77 = arith.constant 0 : index
    %97 = vector.load %arg7[%c1_75, %c0_76, %c0_77] : memref<4x1x16xf32, #tpu.memory_space<vmem>>, vector<1x1x16xf32>
    %98 = vector.shape_cast %97 : vector<1x1x16xf32> to vector<1x16xf32>
    %99 = vector.broadcast %98 : vector<1x16xf32> to vector<8x16xf32>
    %100 = arith.addf %96, %99 : vector<8x16xf32>
    %c1_78 = arith.constant 1 : index
    %c0_79 = arith.constant 0 : index
    %c0_80 = arith.constant 0 : index
    %101 = vector.load %arg8[%c1_78, %c0_79, %c0_80] : memref<4x32x16xbf16, #tpu.memory_space<vmem>>, vector<1x32x16xbf16>
    %102 = vector.shape_cast %101 : vector<1x32x16xbf16> to vector<32x16xbf16>
    %cst_81 = arith.constant dense<0.000000e+00> : vector<8x16xf32>
    %103 = tpu.matmul %93, %102, %cst_81 {dimension_numbers = #tpu.dot_dimension_numbers<[1], [0], [0], [1], [0, 0, 1, 1], [], []>} : vector<8x32xbf16>, vector<32x16xbf16>, vector<8x16xf32> -> vector<8x16xf32>
    %c1_82 = arith.constant 1 : index
    %c0_83 = arith.constant 0 : index
    %c0_84 = arith.constant 0 : index
    %104 = vector.load %arg9[%c1_82, %c0_83, %c0_84] : memref<4x1x16xf32, #tpu.memory_space<vmem>>, vector<1x1x16xf32>
    %105 = vector.shape_cast %104 : vector<1x1x16xf32> to vector<1x16xf32>
    %106 = vector.broadcast %105 : vector<1x16xf32> to vector<8x16xf32>
    %107 = arith.addf %103, %106 : vector<8x16xf32>
    %cst_85 = arith.constant 2.000000e+00 : f32
    %108 = vector.broadcast %cst_85 : f32 to vector<8x16xf32>
    %109 = arith.addf %100, %108 : vector<8x16xf32>
    %cst_86 = arith.constant 0.000000e+00 : f32
    %110 = vector.broadcast %cst_86 : f32 to vector<8x16xf32>
    %111 = arith.subf %110, %109 : vector<8x16xf32>
    %112 = math.exp %111 : vector<8x16xf32>
    %cst_87 = arith.constant 1.000000e+00 : f32
    %113 = vector.broadcast %cst_87 : f32 to vector<8x16xf32>
    %114 = arith.addf %113, %112 : vector<8x16xf32>
    %cst_88 = arith.constant 1.000000e+00 : f32
    %115 = vector.broadcast %cst_88 : f32 to vector<8x16xf32>
    %116 = arith.divf %115, %114 : vector<8x16xf32>
    %117 = arith.addf %72, %107 : vector<8x16xf32>
    %118 = arith.mulf %117, %116 : vector<8x16xf32>
    %cst_89 = arith.constant 1.000000e+00 : f32
    %119 = vector.broadcast %cst_89 : f32 to vector<8x16xf32>
    %120 = arith.addf %119, %112 : vector<8x16xf32>
    %121 = math.log %120 : vector<8x16xf32>
    %cst_90 = arith.constant dense<0.000000e+00> : vector<8xf32>
    %122 = vector.multi_reduction <add>, %121, %cst_90 [1] : vector<8x16xf32> to vector<8xf32>
    %cst_91 = arith.constant 0.000000e+00 : f32
    %123 = vector.broadcast %cst_91 : f32 to vector<8xf32>
    %124 = arith.subf %123, %122 : vector<8xf32>
    %c1_92 = arith.constant 1 : index
    %c0_93 = arith.constant 0 : index
    %125 = vector.load %arg15[%c1_92, %c0_93] : memref<4x8xf32, #tpu.memory_space<vmem>>, vector<1x8xf32>
    %126 = vector.shape_cast %125 : vector<1x8xf32> to vector<8xf32>
    %127 = vector.shape_cast %124 : vector<8xf32> to vector<1x8xf32>
    tpu.vector_store %arg15[%c1_92, %c0_93], %127 {strides = array<i32>} : memref<4x8xf32, #tpu.memory_space<vmem>>, vector<1x8xf32>,
    %128 = arith.truncf %65 : vector<8x16xf32> to vector<8x16xbf16>
    %129 = arith.truncf %118 : vector<8x16xf32> to vector<8x16xbf16>
    %c1_94 = arith.constant 1 : index
    %c0_95 = arith.constant 0 : index
    %c0_96 = arith.constant 0 : index
    %130 = vector.load %arg10[%c1_94, %c0_95, %c0_96] : memref<3x16x16xbf16, #tpu.memory_space<vmem>>, vector<1x16x16xbf16>
    %131 = vector.shape_cast %130 : vector<1x16x16xbf16> to vector<16x16xbf16>
    %cst_97 = arith.constant dense<0.000000e+00> : vector<8x16xf32>
    %132 = tpu.matmul %128, %131, %cst_97 {dimension_numbers = #tpu.dot_dimension_numbers<[1], [0], [0], [1], [0, 0, 1, 1], [], []>} : vector<8x16xbf16>, vector<16x16xbf16>, vector<8x16xf32> -> vector<8x16xf32>
    %c1_98 = arith.constant 1 : index
    %c0_99 = arith.constant 0 : index
    %c0_100 = arith.constant 0 : index
    %133 = vector.load %arg11[%c1_98, %c0_99, %c0_100] : memref<3x16x16xbf16, #tpu.memory_space<vmem>>, vector<1x16x16xbf16>
    %134 = vector.shape_cast %133 : vector<1x16x16xbf16> to vector<16x16xbf16>
    %cst_101 = arith.constant dense<0.000000e+00> : vector<8x16xf32>
    %135 = tpu.matmul %129, %134, %cst_101 {dimension_numbers = #tpu.dot_dimension_numbers<[1], [0], [0], [1], [0, 0, 1, 1], [], []>} : vector<8x16xbf16>, vector<16x16xbf16>, vector<8x16xf32> -> vector<8x16xf32>
    %136 = arith.addf %132, %135 : vector<8x16xf32>
    %c1_102 = arith.constant 1 : index
    %c0_103 = arith.constant 0 : index
    %c0_104 = arith.constant 0 : index
    %137 = vector.load %arg12[%c1_102, %c0_103, %c0_104] : memref<3x16x16xbf16, #tpu.memory_space<vmem>>, vector<1x16x16xbf16>
    %138 = vector.shape_cast %137 : vector<1x16x16xbf16> to vector<16x16xbf16>
    %cst_105 = arith.constant dense<0.000000e+00> : vector<8x16xf32>
    %139 = tpu.matmul %128, %138, %cst_105 {dimension_numbers = #tpu.dot_dimension_numbers<[1], [0], [0], [1], [0, 0, 1, 1], [], []>} : vector<8x16xbf16>, vector<16x16xbf16>, vector<8x16xf32> -> vector<8x16xf32>
    %c1_106 = arith.constant 1 : index
    %c0_107 = arith.constant 0 : index
    %c0_108 = arith.constant 0 : index
    %140 = vector.load %arg13[%c1_106, %c0_107, %c0_108] : memref<3x16x16xbf16, #tpu.memory_space<vmem>>, vector<1x16x16xbf16>
    %141 = vector.shape_cast %140 : vector<1x16x16xbf16> to vector<16x16xbf16>
    %cst_109 = arith.constant dense<0.000000e+00> : vector<8x16xf32>
    %142 = tpu.matmul %129, %141, %cst_109 {dimension_numbers = #tpu.dot_dimension_numbers<[1], [0], [0], [1], [0, 0, 1, 1], [], []>} : vector<8x16xbf16>, vector<16x16xbf16>, vector<8x16xf32> -> vector<8x16xf32>
    %143 = arith.addf %139, %142 : vector<8x16xf32>
    %144 = arith.truncf %136 : vector<8x16xf32> to vector<8x16xbf16>
    %c2 = arith.constant 2 : index
    %c0_110 = arith.constant 0 : index
    %c0_111 = arith.constant 0 : index
    %145 = vector.load %arg2[%c2, %c0_110, %c0_111] : memref<4x16x32xbf16, #tpu.memory_space<vmem>>, vector<1x16x32xbf16>
    %146 = vector.shape_cast %145 : vector<1x16x32xbf16> to vector<16x32xbf16>
    %cst_112 = arith.constant dense<0.000000e+00> : vector<8x32xf32>
    %147 = tpu.matmul %144, %146, %cst_112 {dimension_numbers = #tpu.dot_dimension_numbers<[1], [0], [0], [1], [0, 0, 1, 1], [], []>} : vector<8x16xbf16>, vector<16x32xbf16>, vector<8x32xf32> -> vector<8x32xf32>
    %c2_113 = arith.constant 2 : index
    %c0_114 = arith.constant 0 : index
    %c0_115 = arith.constant 0 : index
    %148 = vector.load %arg3[%c2_113, %c0_114, %c0_115] : memref<4x1x32xf32, #tpu.memory_space<vmem>>, vector<1x1x32xf32>
    %149 = vector.shape_cast %148 : vector<1x1x32xf32> to vector<1x32xf32>
    %150 = vector.broadcast %149 : vector<1x32xf32> to vector<8x32xf32>
    %151 = arith.addf %147, %150 : vector<8x32xf32>
    %cst_116 = arith.constant 0.000000e+00 : f32
    %152 = vector.broadcast %cst_116 : f32 to vector<8x32xf32>
    %153 = arith.maximumf %151, %152 : vector<8x32xf32>
    %154 = arith.truncf %153 : vector<8x32xf32> to vector<8x32xbf16>
    %c2_117 = arith.constant 2 : index
    %c0_118 = arith.constant 0 : index
    %c0_119 = arith.constant 0 : index
    %155 = vector.load %arg4[%c2_117, %c0_118, %c0_119] : memref<4x32x32xbf16, #tpu.memory_space<vmem>>, vector<1x32x32xbf16>
    %156 = vector.shape_cast %155 : vector<1x32x32xbf16> to vector<32x32xbf16>
    %cst_120 = arith.constant dense<0.000000e+00> : vector<8x32xf32>
    %157 = tpu.matmul %154, %156, %cst_120 {dimension_numbers = #tpu.dot_dimension_numbers<[1], [0], [0], [1], [0, 0, 1, 1], [], []>} : vector<8x32xbf16>, vector<32x32xbf16>, vector<8x32xf32> -> vector<8x32xf32>
    %c2_121 = arith.constant 2 : index
    %c0_122 = arith.constant 0 : index
    %c0_123 = arith.constant 0 : index
    %158 = vector.load %arg5[%c2_121, %c0_122, %c0_123] : memref<4x1x32xf32, #tpu.memory_space<vmem>>, vector<1x1x32xf32>
    %159 = vector.shape_cast %158 : vector<1x1x32xf32> to vector<1x32xf32>
    %160 = vector.broadcast %159 : vector<1x32xf32> to vector<8x32xf32>
    %161 = arith.addf %157, %160 : vector<8x32xf32>
    %cst_124 = arith.constant 0.000000e+00 : f32
    %162 = vector.broadcast %cst_124 : f32 to vector<8x32xf32>
    %163 = arith.maximumf %161, %162 : vector<8x32xf32>
    %164 = arith.truncf %163 : vector<8x32xf32> to vector<8x32xbf16>
    %c2_125 = arith.constant 2 : index
    %c0_126 = arith.constant 0 : index
    %c0_127 = arith.constant 0 : index
    %165 = vector.load %arg6[%c2_125, %c0_126, %c0_127] : memref<4x32x16xbf16, #tpu.memory_space<vmem>>, vector<1x32x16xbf16>
    %166 = vector.shape_cast %165 : vector<1x32x16xbf16> to vector<32x16xbf16>
    %cst_128 = arith.constant dense<0.000000e+00> : vector<8x16xf32>
    %167 = tpu.matmul %164, %166, %cst_128 {dimension_numbers = #tpu.dot_dimension_numbers<[1], [0], [0], [1], [0, 0, 1, 1], [], []>} : vector<8x32xbf16>, vector<32x16xbf16>, vector<8x16xf32> -> vector<8x16xf32>
    %c2_129 = arith.constant 2 : index
    %c0_130 = arith.constant 0 : index
    %c0_131 = arith.constant 0 : index
    %168 = vector.load %arg7[%c2_129, %c0_130, %c0_131] : memref<4x1x16xf32, #tpu.memory_space<vmem>>, vector<1x1x16xf32>
    %169 = vector.shape_cast %168 : vector<1x1x16xf32> to vector<1x16xf32>
    %170 = vector.broadcast %169 : vector<1x16xf32> to vector<8x16xf32>
    %171 = arith.addf %167, %170 : vector<8x16xf32>
    %c2_132 = arith.constant 2 : index
    %c0_133 = arith.constant 0 : index
    %c0_134 = arith.constant 0 : index
    %172 = vector.load %arg8[%c2_132, %c0_133, %c0_134] : memref<4x32x16xbf16, #tpu.memory_space<vmem>>, vector<1x32x16xbf16>
    %173 = vector.shape_cast %172 : vector<1x32x16xbf16> to vector<32x16xbf16>
    %cst_135 = arith.constant dense<0.000000e+00> : vector<8x16xf32>
    %174 = tpu.matmul %164, %173, %cst_135 {dimension_numbers = #tpu.dot_dimension_numbers<[1], [0], [0], [1], [0, 0, 1, 1], [], []>} : vector<8x32xbf16>, vector<32x16xbf16>, vector<8x16xf32> -> vector<8x16xf32>
    %c2_136 = arith.constant 2 : index
    %c0_137 = arith.constant 0 : index
    %c0_138 = arith.constant 0 : index
    %175 = vector.load %arg9[%c2_136, %c0_137, %c0_138] : memref<4x1x16xf32, #tpu.memory_space<vmem>>, vector<1x1x16xf32>
    %176 = vector.shape_cast %175 : vector<1x1x16xf32> to vector<1x16xf32>
    %177 = vector.broadcast %176 : vector<1x16xf32> to vector<8x16xf32>
    %178 = arith.addf %174, %177 : vector<8x16xf32>
    %cst_139 = arith.constant 2.000000e+00 : f32
    %179 = vector.broadcast %cst_139 : f32 to vector<8x16xf32>
    %180 = arith.addf %171, %179 : vector<8x16xf32>
    %cst_140 = arith.constant 0.000000e+00 : f32
    %181 = vector.broadcast %cst_140 : f32 to vector<8x16xf32>
    %182 = arith.subf %181, %180 : vector<8x16xf32>
    %183 = math.exp %182 : vector<8x16xf32>
    %cst_141 = arith.constant 1.000000e+00 : f32
    %184 = vector.broadcast %cst_141 : f32 to vector<8x16xf32>
    %185 = arith.addf %184, %183 : vector<8x16xf32>
    %cst_142 = arith.constant 1.000000e+00 : f32
    %186 = vector.broadcast %cst_142 : f32 to vector<8x16xf32>
    %187 = arith.divf %186, %185 : vector<8x16xf32>
    %188 = arith.addf %143, %178 : vector<8x16xf32>
    %189 = arith.mulf %188, %187 : vector<8x16xf32>
    %cst_143 = arith.constant 1.000000e+00 : f32
    %190 = vector.broadcast %cst_143 : f32 to vector<8x16xf32>
    %191 = arith.addf %190, %183 : vector<8x16xf32>
    %192 = math.log %191 : vector<8x16xf32>
    %cst_144 = arith.constant dense<0.000000e+00> : vector<8xf32>
    %193 = vector.multi_reduction <add>, %192, %cst_144 [1] : vector<8x16xf32> to vector<8xf32>
    %cst_145 = arith.constant 0.000000e+00 : f32
    %194 = vector.broadcast %cst_145 : f32 to vector<8xf32>
    %195 = arith.subf %194, %193 : vector<8xf32>
    %c2_146 = arith.constant 2 : index
    %c0_147 = arith.constant 0 : index
    %196 = vector.load %arg15[%c2_146, %c0_147] : memref<4x8xf32, #tpu.memory_space<vmem>>, vector<1x8xf32>
    %197 = vector.shape_cast %196 : vector<1x8xf32> to vector<8xf32>
    %198 = vector.shape_cast %195 : vector<8xf32> to vector<1x8xf32>
    tpu.vector_store %arg15[%c2_146, %c0_147], %198 {strides = array<i32>} : memref<4x8xf32, #tpu.memory_space<vmem>>, vector<1x8xf32>,
    %199 = arith.truncf %136 : vector<8x16xf32> to vector<8x16xbf16>
    %200 = arith.truncf %189 : vector<8x16xf32> to vector<8x16xbf16>
    %c2_148 = arith.constant 2 : index
    %c0_149 = arith.constant 0 : index
    %c0_150 = arith.constant 0 : index
    %201 = vector.load %arg10[%c2_148, %c0_149, %c0_150] : memref<3x16x16xbf16, #tpu.memory_space<vmem>>, vector<1x16x16xbf16>
    %202 = vector.shape_cast %201 : vector<1x16x16xbf16> to vector<16x16xbf16>
    %cst_151 = arith.constant dense<0.000000e+00> : vector<8x16xf32>
    %203 = tpu.matmul %199, %202, %cst_151 {dimension_numbers = #tpu.dot_dimension_numbers<[1], [0], [0], [1], [0, 0, 1, 1], [], []>} : vector<8x16xbf16>, vector<16x16xbf16>, vector<8x16xf32> -> vector<8x16xf32>
    %c2_152 = arith.constant 2 : index
    %c0_153 = arith.constant 0 : index
    %c0_154 = arith.constant 0 : index
    %204 = vector.load %arg11[%c2_152, %c0_153, %c0_154] : memref<3x16x16xbf16, #tpu.memory_space<vmem>>, vector<1x16x16xbf16>
    %205 = vector.shape_cast %204 : vector<1x16x16xbf16> to vector<16x16xbf16>
    %cst_155 = arith.constant dense<0.000000e+00> : vector<8x16xf32>
    %206 = tpu.matmul %200, %205, %cst_155 {dimension_numbers = #tpu.dot_dimension_numbers<[1], [0], [0], [1], [0, 0, 1, 1], [], []>} : vector<8x16xbf16>, vector<16x16xbf16>, vector<8x16xf32> -> vector<8x16xf32>
    %207 = arith.addf %203, %206 : vector<8x16xf32>
    %c2_156 = arith.constant 2 : index
    %c0_157 = arith.constant 0 : index
    %c0_158 = arith.constant 0 : index
    %208 = vector.load %arg12[%c2_156, %c0_157, %c0_158] : memref<3x16x16xbf16, #tpu.memory_space<vmem>>, vector<1x16x16xbf16>
    %209 = vector.shape_cast %208 : vector<1x16x16xbf16> to vector<16x16xbf16>
    %cst_159 = arith.constant dense<0.000000e+00> : vector<8x16xf32>
    %210 = tpu.matmul %199, %209, %cst_159 {dimension_numbers = #tpu.dot_dimension_numbers<[1], [0], [0], [1], [0, 0, 1, 1], [], []>} : vector<8x16xbf16>, vector<16x16xbf16>, vector<8x16xf32> -> vector<8x16xf32>
    %c2_160 = arith.constant 2 : index
    %c0_161 = arith.constant 0 : index
    %c0_162 = arith.constant 0 : index
    %211 = vector.load %arg13[%c2_160, %c0_161, %c0_162] : memref<3x16x16xbf16, #tpu.memory_space<vmem>>, vector<1x16x16xbf16>
    %212 = vector.shape_cast %211 : vector<1x16x16xbf16> to vector<16x16xbf16>
    %cst_163 = arith.constant dense<0.000000e+00> : vector<8x16xf32>
    %213 = tpu.matmul %200, %212, %cst_163 {dimension_numbers = #tpu.dot_dimension_numbers<[1], [0], [0], [1], [0, 0, 1, 1], [], []>} : vector<8x16xbf16>, vector<16x16xbf16>, vector<8x16xf32> -> vector<8x16xf32>
    %214 = arith.addf %210, %213 : vector<8x16xf32>
    %215 = arith.truncf %207 : vector<8x16xf32> to vector<8x16xbf16>
    %c3 = arith.constant 3 : index
    %c0_164 = arith.constant 0 : index
    %c0_165 = arith.constant 0 : index
    %216 = vector.load %arg2[%c3, %c0_164, %c0_165] : memref<4x16x32xbf16, #tpu.memory_space<vmem>>, vector<1x16x32xbf16>
    %217 = vector.shape_cast %216 : vector<1x16x32xbf16> to vector<16x32xbf16>
    %cst_166 = arith.constant dense<0.000000e+00> : vector<8x32xf32>
    %218 = tpu.matmul %215, %217, %cst_166 {dimension_numbers = #tpu.dot_dimension_numbers<[1], [0], [0], [1], [0, 0, 1, 1], [], []>} : vector<8x16xbf16>, vector<16x32xbf16>, vector<8x32xf32> -> vector<8x32xf32>
    %c3_167 = arith.constant 3 : index
    %c0_168 = arith.constant 0 : index
    %c0_169 = arith.constant 0 : index
    %219 = vector.load %arg3[%c3_167, %c0_168, %c0_169] : memref<4x1x32xf32, #tpu.memory_space<vmem>>, vector<1x1x32xf32>
    %220 = vector.shape_cast %219 : vector<1x1x32xf32> to vector<1x32xf32>
    %221 = vector.broadcast %220 : vector<1x32xf32> to vector<8x32xf32>
    %222 = arith.addf %218, %221 : vector<8x32xf32>
    %cst_170 = arith.constant 0.000000e+00 : f32
    %223 = vector.broadcast %cst_170 : f32 to vector<8x32xf32>
    %224 = arith.maximumf %222, %223 : vector<8x32xf32>
    %225 = arith.truncf %224 : vector<8x32xf32> to vector<8x32xbf16>
    %c3_171 = arith.constant 3 : index
    %c0_172 = arith.constant 0 : index
    %c0_173 = arith.constant 0 : index
    %226 = vector.load %arg4[%c3_171, %c0_172, %c0_173] : memref<4x32x32xbf16, #tpu.memory_space<vmem>>, vector<1x32x32xbf16>
    %227 = vector.shape_cast %226 : vector<1x32x32xbf16> to vector<32x32xbf16>
    %cst_174 = arith.constant dense<0.000000e+00> : vector<8x32xf32>
    %228 = tpu.matmul %225, %227, %cst_174 {dimension_numbers = #tpu.dot_dimension_numbers<[1], [0], [0], [1], [0, 0, 1, 1], [], []>} : vector<8x32xbf16>, vector<32x32xbf16>, vector<8x32xf32> -> vector<8x32xf32>
    %c3_175 = arith.constant 3 : index
    %c0_176 = arith.constant 0 : index
    %c0_177 = arith.constant 0 : index
    %229 = vector.load %arg5[%c3_175, %c0_176, %c0_177] : memref<4x1x32xf32, #tpu.memory_space<vmem>>, vector<1x1x32xf32>
    %230 = vector.shape_cast %229 : vector<1x1x32xf32> to vector<1x32xf32>
    %231 = vector.broadcast %230 : vector<1x32xf32> to vector<8x32xf32>
    %232 = arith.addf %228, %231 : vector<8x32xf32>
    %cst_178 = arith.constant 0.000000e+00 : f32
    %233 = vector.broadcast %cst_178 : f32 to vector<8x32xf32>
    %234 = arith.maximumf %232, %233 : vector<8x32xf32>
    %235 = arith.truncf %234 : vector<8x32xf32> to vector<8x32xbf16>
    %c3_179 = arith.constant 3 : index
    %c0_180 = arith.constant 0 : index
    %c0_181 = arith.constant 0 : index
    %236 = vector.load %arg6[%c3_179, %c0_180, %c0_181] : memref<4x32x16xbf16, #tpu.memory_space<vmem>>, vector<1x32x16xbf16>
    %237 = vector.shape_cast %236 : vector<1x32x16xbf16> to vector<32x16xbf16>
    %cst_182 = arith.constant dense<0.000000e+00> : vector<8x16xf32>
    %238 = tpu.matmul %235, %237, %cst_182 {dimension_numbers = #tpu.dot_dimension_numbers<[1], [0], [0], [1], [0, 0, 1, 1], [], []>} : vector<8x32xbf16>, vector<32x16xbf16>, vector<8x16xf32> -> vector<8x16xf32>
    %c3_183 = arith.constant 3 : index
    %c0_184 = arith.constant 0 : index
    %c0_185 = arith.constant 0 : index
    %239 = vector.load %arg7[%c3_183, %c0_184, %c0_185] : memref<4x1x16xf32, #tpu.memory_space<vmem>>, vector<1x1x16xf32>
    %240 = vector.shape_cast %239 : vector<1x1x16xf32> to vector<1x16xf32>
    %241 = vector.broadcast %240 : vector<1x16xf32> to vector<8x16xf32>
    %242 = arith.addf %238, %241 : vector<8x16xf32>
    %c3_186 = arith.constant 3 : index
    %c0_187 = arith.constant 0 : index
    %c0_188 = arith.constant 0 : index
    %243 = vector.load %arg8[%c3_186, %c0_187, %c0_188] : memref<4x32x16xbf16, #tpu.memory_space<vmem>>, vector<1x32x16xbf16>
    %244 = vector.shape_cast %243 : vector<1x32x16xbf16> to vector<32x16xbf16>
    %cst_189 = arith.constant dense<0.000000e+00> : vector<8x16xf32>
    %245 = tpu.matmul %235, %244, %cst_189 {dimension_numbers = #tpu.dot_dimension_numbers<[1], [0], [0], [1], [0, 0, 1, 1], [], []>} : vector<8x32xbf16>, vector<32x16xbf16>, vector<8x16xf32> -> vector<8x16xf32>
    %c3_190 = arith.constant 3 : index
    %c0_191 = arith.constant 0 : index
    %c0_192 = arith.constant 0 : index
    %246 = vector.load %arg9[%c3_190, %c0_191, %c0_192] : memref<4x1x16xf32, #tpu.memory_space<vmem>>, vector<1x1x16xf32>
    %247 = vector.shape_cast %246 : vector<1x1x16xf32> to vector<1x16xf32>
    %248 = vector.broadcast %247 : vector<1x16xf32> to vector<8x16xf32>
    %249 = arith.addf %245, %248 : vector<8x16xf32>
    %cst_193 = arith.constant 2.000000e+00 : f32
    %250 = vector.broadcast %cst_193 : f32 to vector<8x16xf32>
    %251 = arith.addf %242, %250 : vector<8x16xf32>
    %cst_194 = arith.constant 0.000000e+00 : f32
    %252 = vector.broadcast %cst_194 : f32 to vector<8x16xf32>
    %253 = arith.subf %252, %251 : vector<8x16xf32>
    %254 = math.exp %253 : vector<8x16xf32>
    %cst_195 = arith.constant 1.000000e+00 : f32
    %255 = vector.broadcast %cst_195 : f32 to vector<8x16xf32>
    %256 = arith.addf %255, %254 : vector<8x16xf32>
    %cst_196 = arith.constant 1.000000e+00 : f32
    %257 = vector.broadcast %cst_196 : f32 to vector<8x16xf32>
    %258 = arith.divf %257, %256 : vector<8x16xf32>
    %259 = arith.addf %214, %249 : vector<8x16xf32>
    %260 = arith.mulf %259, %258 : vector<8x16xf32>
    %cst_197 = arith.constant 1.000000e+00 : f32
    %261 = vector.broadcast %cst_197 : f32 to vector<8x16xf32>
    %262 = arith.addf %261, %254 : vector<8x16xf32>
    %263 = math.log %262 : vector<8x16xf32>
    %cst_198 = arith.constant dense<0.000000e+00> : vector<8xf32>
    %264 = vector.multi_reduction <add>, %263, %cst_198 [1] : vector<8x16xf32> to vector<8xf32>
    %cst_199 = arith.constant 0.000000e+00 : f32
    %265 = vector.broadcast %cst_199 : f32 to vector<8xf32>
    %266 = arith.subf %265, %264 : vector<8xf32>
    %c3_200 = arith.constant 3 : index
    %c0_201 = arith.constant 0 : index
    %267 = vector.load %arg15[%c3_200, %c0_201] : memref<4x8xf32, #tpu.memory_space<vmem>>, vector<1x8xf32>
    %268 = vector.shape_cast %267 : vector<1x8xf32> to vector<8xf32>
    %269 = vector.shape_cast %266 : vector<8xf32> to vector<1x8xf32>
    tpu.vector_store %arg15[%c3_200, %c0_201], %269 {strides = array<i32>} : memref<4x8xf32, #tpu.memory_space<vmem>>, vector<1x8xf32>,
    %c0_202 = arith.constant 0 : index
    %c0_203 = arith.constant 0 : index
    %270 = vector.load %arg14[%c0_202, %c0_203] : memref<8x32xf32, #tpu.memory_space<vmem>>, vector<8x16xf32>
    tpu.vector_store %arg14[%c0_202, %c0_203], %207 {strides = array<i32>} : memref<8x32xf32, #tpu.memory_space<vmem>>, vector<8x16xf32>,
    %c0_204 = arith.constant 0 : index
    %c16_205 = arith.constant 16 : index
    %271 = vector.load %arg14[%c0_204, %c16_205] : memref<8x32xf32, #tpu.memory_space<vmem>>, vector<8x16xf32>
    tpu.vector_store %arg14[%c0_204, %c16_205], %260 {strides = array<i32>} : memref<8x32xf32, #tpu.memory_space<vmem>>, vector<8x16xf32>,
    return
  }
  func.func @transform_0(%arg0: i32) -> (i32, i32) {
    %c0_i32 = arith.constant 0 : i32
    %c0_i32_0 = arith.constant 0 : i32
    return %arg0, %c0_i32 : i32, i32
  }
  func.func @transform_1(%arg0: i32) -> (i32, i32, i32) {
    %c0_i32 = arith.constant 0 : i32
    %c0_i32_0 = arith.constant 0 : i32
    %c0_i32_1 = arith.constant 0 : i32
    %c0_i32_2 = arith.constant 0 : i32
    return %c0_i32, %c0_i32_0, %c0_i32_1 : i32, i32, i32
  }
  func.func @transform_2(%arg0: i32) -> (i32, i32, i32) {
    %c0_i32 = arith.constant 0 : i32
    %c0_i32_0 = arith.constant 0 : i32
    %c0_i32_1 = arith.constant 0 : i32
    %c0_i32_2 = arith.constant 0 : i32
    return %c0_i32, %c0_i32_0, %c0_i32_1 : i32, i32, i32
  }
  func.func @transform_3(%arg0: i32) -> (i32, i32, i32) {
    %c0_i32 = arith.constant 0 : i32
    %c0_i32_0 = arith.constant 0 : i32
    %c0_i32_1 = arith.constant 0 : i32
    %c0_i32_2 = arith.constant 0 : i32
    return %c0_i32, %c0_i32_0, %c0_i32_1 : i32, i32, i32
  }
  func.func @transform_4(%arg0: i32) -> (i32, i32, i32) {
    %c0_i32 = arith.constant 0 : i32
    %c0_i32_0 = arith.constant 0 : i32
    %c0_i32_1 = arith.constant 0 : i32
    %c0_i32_2 = arith.constant 0 : i32
    return %c0_i32, %c0_i32_0, %c0_i32_1 : i32, i32, i32
  }
  func.func @transform_5(%arg0: i32) -> (i32, i32, i32) {
    %c0_i32 = arith.constant 0 : i32
    %c0_i32_0 = arith.constant 0 : i32
    %c0_i32_1 = arith.constant 0 : i32
    %c0_i32_2 = arith.constant 0 : i32
    return %c0_i32, %c0_i32_0, %c0_i32_1 : i32, i32, i32
  }
  func.func @transform_6(%arg0: i32) -> (i32, i32, i32) {
    %c0_i32 = arith.constant 0 : i32
    %c0_i32_0 = arith.constant 0 : i32
    %c0_i32_1 = arith.constant 0 : i32
    %c0_i32_2 = arith.constant 0 : i32
    return %c0_i32, %c0_i32_0, %c0_i32_1 : i32, i32, i32
  }
  func.func @transform_7(%arg0: i32) -> (i32, i32, i32) {
    %c0_i32 = arith.constant 0 : i32
    %c0_i32_0 = arith.constant 0 : i32
    %c0_i32_1 = arith.constant 0 : i32
    %c0_i32_2 = arith.constant 0 : i32
    return %c0_i32, %c0_i32_0, %c0_i32_1 : i32, i32, i32
  }
  func.func @transform_8(%arg0: i32) -> (i32, i32, i32) {
    %c0_i32 = arith.constant 0 : i32
    %c0_i32_0 = arith.constant 0 : i32
    %c0_i32_1 = arith.constant 0 : i32
    %c0_i32_2 = arith.constant 0 : i32
    return %c0_i32, %c0_i32_0, %c0_i32_1 : i32, i32, i32
  }
  func.func @transform_9(%arg0: i32) -> (i32, i32, i32) {
    %c0_i32 = arith.constant 0 : i32
    %c0_i32_0 = arith.constant 0 : i32
    %c0_i32_1 = arith.constant 0 : i32
    %c0_i32_2 = arith.constant 0 : i32
    return %c0_i32, %c0_i32_0, %c0_i32_1 : i32, i32, i32
  }
  func.func @transform_10(%arg0: i32) -> (i32, i32, i32) {
    %c0_i32 = arith.constant 0 : i32
    %c0_i32_0 = arith.constant 0 : i32
    %c0_i32_1 = arith.constant 0 : i32
    %c0_i32_2 = arith.constant 0 : i32
    return %c0_i32, %c0_i32_0, %c0_i32_1 : i32, i32, i32
  }
  func.func @transform_11(%arg0: i32) -> (i32, i32, i32) {
    %c0_i32 = arith.constant 0 : i32
    %c0_i32_0 = arith.constant 0 : i32
    %c0_i32_1 = arith.constant 0 : i32
    %c0_i32_2 = arith.constant 0 : i32
    return %c0_i32, %c0_i32_0, %c0_i32_1 : i32, i32, i32
  }
  func.func @transform_12(%arg0: i32) -> (i32, i32, i32) {
    %c0_i32 = arith.constant 0 : i32
    %c0_i32_0 = arith.constant 0 : i32
    %c0_i32_1 = arith.constant 0 : i32
    %c0_i32_2 = arith.constant 0 : i32
    return %c0_i32, %c0_i32_0, %c0_i32_1 : i32, i32, i32
  }
  func.func @transform_13(%arg0: i32) -> (i32, i32) {
    %c0_i32 = arith.constant 0 : i32
    %c0_i32_0 = arith.constant 0 : i32
    return %arg0, %c0_i32 : i32, i32
  }
  func.func @transform_14(%arg0: i32) -> (i32, i32) {
    %c0_i32 = arith.constant 0 : i32
    %c0_i32_0 = arith.constant 0 : i32
    return %c0_i32, %arg0 : i32, i32
  }
}

</mosaic_0001>

<bundles_post_ra>
// kernel: tpu_custom_call.1
= control target key start
LH: loop header
LB: loop body
LE: loop exit
PB: predicated region body
PF: predicated region fallthrough
CT: control target
= control target key end

     0   :  { %20 = vsyncpa [#allocation3], 0  ;;  %s2948_s0 = inlined_call_operand.hbm [shape: f32[8,32], index: 0, kind: input, shape index: {}]   ;;  %s2949_s1 = inlined_call_operand.vmem [shape: bf16[4,16,32], index: 1, kind: input, shape index: {}]   ;;  %s2950_s2 = inlined_call_operand.hbm [shape: f32[4,1,32], index: 2, kind: input, shape index: {}]   ;;  %s2951_s3 = inlined_call_operand.vmem [shape: bf16[4,32,32], index: 3, kind: input, shape index: {}]   ;;  %s2952_s4 = inlined_call_operand.hbm [shape: f32[4,1,32], index: 4, kind: input, shape index: {}]   ;;  %s2953_s5 = inlined_call_operand.vmem [shape: bf16[4,32,16], index: 5, kind: input, shape index: {}]   ;;  %s2954_s6 = inlined_call_operand.hbm [shape: f32[4,1,16], index: 6, kind: input, shape index: {}]   ;;  %s2955_s7 = inlined_call_operand.vmem [shape: bf16[4,32,16], index: 7, kind: input, shape index: {}]   ;;  %s2956_s8 = inlined_call_operand.vmem [shape: f32[4,1,16], index: 8, kind: input, shape index: {}]   ;;  %s2957_s9 = inlined_call_operand.vmem [shape: bf16[3,16,16], index: 9, kind: input, shape index: {}]   ;;  %s2958_s10 = inlined_call_operand.vmem [shape: bf16[3,16,16], index: 10, kind: input, shape index: {}]   ;;  %s2959_s11 = inlined_call_operand.vmem [shape: bf16[3,16,16], index: 11, kind: input, shape index: {}]   ;;  %s2960_s12 = inlined_call_operand.hbm [shape: bf16[3,16,16], index: 12, kind: input, shape index: {}]   ;;  %s2961_s13 = inlined_call_operand.hbm [shape: f32[8,32], index: 13, kind: output, shape index: {0}]   ;;  %s2962_s14 = inlined_call_operand.hbm [shape: f32[4,8], index: 14, kind: output, shape index: {1}]  }
   0x1   :  { %21 = vsyncpa [#allocation6], 0 }
   0x2   :  { %22 = vsyncpa [#allocation9], 0 }
   0x3   :  { %23 = vsyncpa [#allocation4], 0 }
   0x4   :  { %24 = vsyncpa [#allocation13], 0  ;;  %s2539_s29 = smov [#allocation5]  }
   0x5   :  { %s42_s30 = sshll.u32 %s2539_s29, 4  ;;  %s43_s30 = int_to_ptr.vmem [resolvable:$true] %s42_s30 }
   0x6   :  { %s2397_s15 = scalar_lea.vmem %s43_s30, 64  ;;  %p2402_p1 = scmp.lt.s32.totalorder %s43_s30, %s43_s30 }
   0x7   :  { %p2398_p0 = scmp.ne.s32.totalorder %s43_s30, %s2397_s15  ;;  %p2403_p2 = scmp.lt.s32.totalorder %s2397_s15, %s2397_s15 }
   0x9   :  { %p2404_p3 = por %p2403_p2, %p2402_p1 }
   0xb   :  { %p2405_p4 = pnand %p2404_p3, %p2398_p0 }
   0xd   :  { %2408 = shalt.err (!%p2405_p4)
}
   0xe   :  { %s2540_s16 = smov 16   ;;  %s2541_s17 = smov 1  }
   0xf   :  { %48 = dma.hbm_to_vmem [thread:$0]  %s2950_s2, 64, %s43_s30, [#allocation6], %s2540_s16, %s2540_s16, %s2541_s17  }
  0x10   :  { %s2542_s20 = smov [#allocation8]   ;;  %s2543_s22 = smov [#allocation2]  }
  0x11   :  { %s70_s21 = sshll.u32 %s2542_s20, 4  ;;  %s31_s23 = sshll.u32 %s2543_s22, 4  ;;  %s71_s21 = int_to_ptr.vmem [resolvable:$true] %s70_s21  ;;  %s32_s23 = int_to_ptr.vmem [resolvable:$true] %s31_s23 }
  0x12   :  { %s2417_s24 = scalar_lea.vmem %s71_s21, 64  ;;  %p2422_p6 = scmp.lt.s32.totalorder %s71_s21, %s71_s21 }
  0x13   :  { %p2418_p5 = scmp.ne.s32.totalorder %s71_s21, %s2417_s24  ;;  %p2423_p7 = scmp.lt.s32.totalorder %s2417_s24, %s2417_s24 }
  0x15   :  { %p2424_p8 = por %p2423_p7, %p2422_p6 }
  0x17   :  { %p2425_p9 = pnand %p2424_p8, %p2418_p5 }
  0x19   :  { %2428 = shalt.err (!%p2425_p9)
}
  0x1a   :  { %76 = dma.hbm_to_vmem [thread:$0]  %s2954_s6, 64, %s71_s21, [#allocation9], %s2540_s16, %s2540_s16, %s2541_s17  }
  0x1b   :  { %s2437_s2 = scalar_lea.vmem %s32_s23, 128  ;;  %p2442_p11 = scmp.lt.s32.totalorder %s32_s23, %s32_s23 }
  0x1c   :  { %p2438_p10 = scmp.ne.s32.totalorder %s32_s23, %s2437_s2  ;;  %p2443_p12 = scmp.lt.s32.totalorder %s2437_s2, %s2437_s2 }
  0x1e   :  { %p2444_p13 = por %p2443_p12, %p2442_p11 }
  0x20   :  { %p2445_p0 = pnand %p2444_p13, %p2438_p10 }
  0x22   :  { %2448 = shalt.err (!%p2445_p0)
}
  0x23   :  { %34 = dma.hbm_to_vmem [thread:$0]  %s2948_s0, 128, %s32_s23, [#allocation3]  }
  0x24   :  { %s2544_s29 = smov [#allocation7]   ;;  %s2545_s15 = smov [#allocation10]  }
  0x25   :  { %s56_s30 = sshll.u32 %s2544_s29, 4  ;;  %s92_s18 = sshll.u32 %s2545_s15, 4  ;;  %s57_s30 = int_to_ptr.vmem [resolvable:$true] %s56_s30  ;;  %s93_s18 = int_to_ptr.vmem [resolvable:$true] %s92_s18 }
  0x26   :  { %s2457_s19 = scalar_lea.vmem %s57_s30, 64  ;;  %p2462_p2 = scmp.lt.s32.totalorder %s57_s30, %s57_s30 }
  0x27   :  { %p2458_p1 = scmp.ne.s32.totalorder %s57_s30, %s2457_s19  ;;  %p2463_p3 = scmp.lt.s32.totalorder %s2457_s19, %s2457_s19 }
  0x29   :  { %p2464_p4 = por %p2463_p3, %p2462_p2 }
  0x2b   :  { %p2465_p5 = pnand %p2464_p4, %p2458_p1 }
  0x2d   :  { %2468 = shalt.err (!%p2465_p5)
}
  0x2e   :  { %62 = dma.hbm_to_vmem [thread:$0]  %s2952_s4, 64, %s57_s30, [#allocation6], %s2540_s16, %s2540_s16, %s2541_s17  }
  0x2f   :  { %s2477_s0 = scalar_lea.vmem %s93_s18, 384  ;;  %p2482_p7 = scmp.lt.s32.totalorder %s93_s18, %s93_s18 }
  0x30   :  { %p2478_p6 = scmp.ne.s32.totalorder %s93_s18, %s2477_s0  ;;  %p2483_p8 = scmp.lt.s32.totalorder %s2477_s0, %s2477_s0 }
  0x32   :  { %p2484_p9 = por %p2483_p8, %p2482_p7 }
  0x34   :  { %p2485_p10 = pnand %p2484_p9, %p2478_p6 }
  0x36   :  { %2488 = shalt.err (!%p2485_p10)
}
  0x37   :  { %s2546_s21 = smov 64   ;;  %s2547_s22 = smov 4  }
  0x38   :  { %98 = dma.hbm_to_vmem [thread:$0]  %s2960_s12, 384, %s93_s18, [#allocation9], %s2546_s21, %s2546_s21, %s2547_s22  }
  0x39   :  { %2529 = dma.done.wait [#allocation3], 128  }
  0x3a   :  { %2530 = vsyncadd [#allocation3], 4294967168 }
  0x3b   :  { %2531 = dma.done.wait [#allocation6], 128  }
  0x3c   :  { %2532 = vsyncadd [#allocation6], 4294967168 }
  0x3d   :  { %2533 = dma.done.wait [#allocation9], 448  }
  0x3e   :  { %2534 = vsyncadd [#allocation9], 4294966848  ;;  %v2548_v0 = vmov 0.0   ;;  %vm2549_vm0 = vmmov 0   ;;  %v2325_v1 = vld [vmem:[%s2949_s1] sm:$0xff]   ;;  %vm132_vm1 = vcmask 130048   ;;  %v400_v62 = vlaneseq }
  0x3f   :  { %2119 = vmatprep.subr.bf16.mxu0 %v2548_v0  ;;  %2121 = vmatprep.mubr.msk.bf16.mxu0 %vm2549_vm0, %v2548_v0  ;;  %v2661_v2 = vld [vmem:[#allocation2] sm:$0xff]  ;;  %v2326_v4 = vld [vmem:[%s2951_s3 + $0x8] sm:$0xff]   ;;  %vm201_vm2 = vcmask 261120   ;;  %v1917_v26 = vld [vmem:[#allocation8] ss:$0 sm:$0xff]  ;;  %s2550_s17 = smov 112  }
  0x40   :  { %2125 = vmatprep.subr.bf16.mxu1 %v2548_v0  ;;  %2129 = vmatprep.mubr.msk.bf16.mxu1 %vm2549_vm0, %v2548_v0  ;;  %v2665_v3 = vpack.c.bf16 %v2661_v2, %v2661_v2  ;;  %v2327_v5 = vld [vmem:[%s2951_s3] sm:$0xff]   ;;  %v2328_v6 = vld [vmem:[%s2953_s5 + $0x8] sm:$0xff]   ;;  %v2334_v59 = vld [vmem:[#allocation10] sm:$0xff]   ;;  %v401_v63 = vand.u32 127, %v400_v62  ;;  %vm407_vm3 = vcmask 57344   ;;  %s2551_s21 = smov [#allocation11]  }
  0x41   :  { %2120 = vmatpush3.bf16.msra.mxu0 %v2325_v1  ;;  %2126 = vmatpush3.bf16.msra.mxu1 %v2326_v4  ;;  %v1910_v7 = vld [vmem:[#allocation5] ss:$0 sm:$0xff]  ;;  %v2330_v16 = vld [vmem:[%s2953_s5] sm:$0xff]   ;;  %v1913_v18 = vld [vmem:[#allocation7] ss:$0 sm:$0xff]  ;;  %v403_v1 = vshrl.u32 %v400_v62, 7 }
  0x42   :  { %2133 = vmatprep.subr.bf16.mxu0 %v2548_v0  ;;  %2127 = vmatprep.subr.bf16.mxu1 %v2548_v0  ;;  %v2329_v15 = vld [vmem:[%s2955_s7 + $0x8] sm:$0xff]   ;;  %v2331_v17 = vld [vmem:[%s2955_s7] sm:$0xff]   ;;  %s1885_s22 = sshll.u32 %s2551_s21, 4  ;;  %vm1877_vm4 = vcmask 261248   ;;  %s1886_s22 = int_to_ptr.vmem [resolvable:$true] %s1885_s22 }
  0x43   :  { %v1921_v27 = vld [vmem:[%s2956_s8] ss:$0 sm:$0xff]  ;;  %v2336_v61 = vld [vmem:[%s2949_s1 + $0x8] sm:$0xff]   ;;  %p2494_p12 = scmp.lt.s32.totalorder %s1886_s22, %s1886_s22 }
  0x44   :  { %2122 = vmatmul.mubr.msk.bf16.vlgmr.msra.gmra.mxu0 %vm132_vm1, %v2665_v3  ;;  %v2332_v44 = vld [vmem:[%s2957_s9] sm:$0xff]  }
  0x45   :  { %2137 = vmatprep.mubr.msk.bf16.mxu0 %vm2549_vm0, %v2548_v0  ;;  %2128 = vmatpush3.bf16.msra.mxu1 %v2327_v5  ;;  %v2333_v45 = vld [vmem:[%s2958_s10] sm:$0xff]  }
  0x46   :  { %2141 = vmatprep.subr.bf16.mxu1 %v2548_v0  ;;  %2134 = vmatpush3.bf16.msra.mxu0 %v2328_v6  ;;  %v2335_v46 = vld [vmem:[%s2959_s11] sm:$0xff]  }
  0x47   :  { %2135 = vmatprep.subr.bf16.mxu0 %v2548_v0 }
  0x4a   :  { %2136 = vmatpush3.bf16.msra.mxu0 %v2330_v16 }
  0x4b   :  { %2149 = vmatprep.subr.bf16.mxu0 %v2548_v0 }
 0x104   :  { %v170_v8 = vpop.f32.mrf.mxu0 }
 0x105   :  { %v171_v9 = vadd.f32 %v1910_v7, %v170_v8 }
 0x106   :  { %v2123_v10 = vpop.f32.mrf.mxu0 }
 0x107   :  { %v176_v11 = vmax.f32 %v171_v9, 0.0  ;;  %v2337_v9 = vld [vmem:[%s2951_s3 + $0x18] sm:$0xff]  }
 0x108   :  { %v173_v12 = vpop.f32.mrf.mxu0 }
 0x109   :  { %v177_v13 = vpack.c.bf16 %v176_v11, %v176_v11 }
 0x10a   :  { %v2124_v14 = vpop.f32.mrf.mxu0 }
 0x10b   :  { %2130 = vmatmul.mubr.msk.bf16.vlgmr.msra.gmra.mxu1 %vm201_vm2, %v177_v13 }
 0x10c   :  { %2145 = vmatprep.mubr.msk.bf16.mxu1 %vm2549_vm0, %v2548_v0  ;;  %2142 = vmatpush3.bf16.msra.mxu1 %v2329_v15 }
 0x10d   :  { %2143 = vmatprep.subr.bf16.mxu1 %v2548_v0 }
 0x110   :  { %2144 = vmatpush3.bf16.msra.mxu1 %v2331_v17 }
 0x111   :  { %2155 = vmatprep.subr.bf16.mxu1 %v2548_v0 }
 0x1cb   :  { %v239_v19 = vpop.f32.mrf.mxu1 }
 0x1cc   :  { %v240_v20 = vadd.f32 %v1913_v18, %v239_v19 }
 0x1cd   :  { %v2131_v21 = vpop.f32.mrf.mxu1 }
 0x1ce   :  { %v245_v22 = vmax.f32 %v240_v20, 0.0  ;;  %v2338_v21 = vld [vmem:[%s2951_s3 + $0x10] sm:$0xff]  }
 0x1cf   :  { %v242_v23 = vpop.f32.mrf.mxu1 }
 0x1d0   :  { %v246_v24 = vpack.c.bf16 %v245_v22, %v245_v22  ;;  %v2339_v22 = vld [vmem:[%s2953_s5 + $0x18] sm:$0xff]   ;;  %v1935_v23 = vld [vmem:[#allocation5 + $0x1] ss:$0 sm:$0xff] }
 0x1d1   :  { %v2132_v25 = vpop.f32.mrf.mxu1 }
 0x1d2   :  { %2138 = vmatmul.mubr.msk.bf16.vlgmr.msra.gmra.mxu0 %vm201_vm2, %v246_v24  ;;  %2146 = vmatmul.mubr.msk.bf16.vlgmr.msra.gmra.mxu1 %vm201_vm2, %v246_v24 }
 0x1d3   :  { %2157 = vmatprep.mubr.msk.bf16.mxu1 %vm2549_vm0, %v2548_v0  ;;  %2151 = vmatprep.mubr.msk.bf16.mxu0 %vm2549_vm0, %v2548_v0 }
 0x1d4   :  { %2156 = vmatpush3.bf16.msra.mxu1 %v2332_v44  ;;  %2150 = vmatpush3.bf16.msra.mxu0 %v2333_v45  ;;  %v2345_v44 = vld [vmem:[%s2958_s10 + $0x8] sm:$0xff]   ;;  %v1950_v45 = vld [vmem:[#allocation8 + $0x1] ss:$0 sm:$0xff] }
 0x1d5   :  { %2161 = vmatprep.subr.bf16.mxu0 %v2548_v0  ;;  %2167 = vmatprep.subr.bf16.mxu1 %v2548_v0 }
 0x1da   :  { %2158 = vmatmul.mubr.msk.bf16.vlgmr.msra.gmra.mxu1 %vm132_vm1, %v2665_v3 }
 0x1db   :  { %2169 = vmatprep.mubr.msk.bf16.mxu1 %vm2549_vm0, %v2548_v0  ;;  %2168 = vmatpush3.bf16.msra.mxu1 %v2335_v46 }
 0x1dc   :  { %2179 = vmatprep.subr.bf16.mxu1 %v2548_v0 }
 0x1e2   :  { %2170 = vmatmul.mubr.msk.bf16.vlgmr.msra.gmra.mxu1 %vm132_vm1, %v2665_v3 }
 0x1e3   :  { %2183 = vmatprep.mubr.msk.bf16.mxu1 %vm2549_vm0, %v2548_v0  ;;  %2180 = vmatpush3.bf16.msra.mxu1 %v2337_v9 }
 0x1e4   :  { %2181 = vmatprep.subr.bf16.mxu1 %v2548_v0 }
 0x1e7   :  { %2182 = vmatpush3.bf16.msra.mxu1 %v2338_v21 }
 0x1e8   :  { %2195 = vmatprep.subr.bf16.mxu1 %v2548_v0 }
 0x292   :  { %v307_v28 = vpop.f32.mrf.mxu0  ;;  %v370_v29 = vpop.f32.mrf.mxu1 }
 0x293   :  { %v308_v30 = vadd.f32 %v1917_v26, %v307_v28  ;;  %v371_v31 = vadd.f32 %v1921_v27, %v370_v29 }
 0x294   :  { %v2139_v32 = vpop.f32.mrf.mxu0  ;;  %v2147_v33 = vpop.f32.mrf.mxu1 }
 0x295   :  { %v376_v34 = vadd.f32 2.0, %v308_v30  ;;  %384 = vrot.lane.b32.xlu0 %v371_v31, %s2540_s16  ;;  %v2340_v31 = vld [vmem:[%s2955_s7 + $0x18] sm:$0xff]   ;;  %v2341_v32 = vld [vmem:[%s2953_s5 + $0x10] sm:$0xff]  }
 0x296   :  { %v310_v35 = vpop.f32.mrf.mxu0  ;;  %v373_v36 = vpop.f32.mrf.mxu1  ;;  %v2342_v33 = vld [vmem:[%s2955_s7 + $0x10] sm:$0xff]  }
 0x297   :  { %v377_v37 = vsub.f32 0.0, %v376_v34  ;;  %v1942_v34 = vld [vmem:[#allocation7 + $0x1] ss:$0 sm:$0xff] }
 0x298   :  { %v2140_v38 = vpop.f32.mrf.mxu0  ;;  %v2148_v39 = vpop.f32.mrf.mxu1 }
 0x299   :  { %v378_v40 = vmul.f32 1.442695, %v377_v37 }
 0x29a   :  { %v506_v55 = vpop.f32.mrf.mxu1 }
 0x29b   :  { %2365 = vpow2.f32 %v378_v40  ;;  %v2343_v40 = vld [vmem:[%s2957_s9 + $0x8] sm:$0xff]  }
 0x29c   :  { %v2159_v56 = vpop.f32.mrf.mxu1 }
 0x29e   :  { %v509_v57 = vpop.f32.mrf.mxu1 }
 0x2a0   :  { %v2160_v58 = vpop.f32.mrf.mxu1 }
 0x2a2   :  { %v2747_v6 = vpop.f32.mrf.mxu1 }
 0x2a4   :  { %v2171_v7 = vpop.f32.mrf.mxu1 }
 0x2a5   :  { %v1959_v7 = vld [vmem:[%s2956_s8 + $0x1] ss:$0 sm:$0xff] }
 0x2a6   :  { %v605_v8 = vpop.f32.mrf.mxu1 }
 0x2a8   :  { %v2366_v41 = vpop.eup %2365  ;;  %v2172_v10 = vpop.f32.mrf.mxu1 }
 0x2a9   :  { %v380_v42 = vadd.f32 1.0, %v2366_v41 }
 0x2ab   :  { %2367 = vrcp.f32 %v380_v42 }
 0x2ac   :  { %2369 = vlog2.f32 %v380_v42 }
 0x2b8   :  { %v2368_v43 = vpop.eup %2367 }
 0x2b9   :  { %389 = vrot.lane.b32.xlu0 %v2368_v43, %s2540_s16  ;;  %v2370_v52 = vpop.eup %2369  ;;  %v2344_v43 = vld [vmem:[%s2959_s11 + $0x8] sm:$0xff]  }
 0x2ba   :  { %v394_v53 = vmul.f32 0.6931472, %v2370_v52 }
 0x2bc   :  { %v395_v54 = vsel %vm132_vm1, %v394_v53, 0.0 }
 0x307   :  { %v385_v47 = vpop.permute.xlu0 %384 }
 0x308   :  { %v387_v48 = vadd.f32 %v385_v47, %v2661_v2  ;;  %v2743_v2 = vsub.s32 %v401_v63, %v403_v1 }
 0x32b   :  { %v390_v49 = vpop.permute.xlu0 %389 }
 0x32c   :  { %v392_v50 = vmul.f32 %v390_v49, %v387_v48 }
 0x32e   :  { %v409_v51 = vpack.c.bf16 %v392_v50, %v392_v50 }
 0x330   :  { %415 = vrot.lane.b32.xlu1 %v409_v51, %s2550_s17 }
 0x354   :  { %396 = vadd.xlane.f32.xlu1 %v395_v54 }
 0x3a2   :  { %v416_v60 = vpop.permute.xlu1 %415 }
 0x3a3   :  { %2152 = vmatmul.mubr.msk.bf16.vlgmr.msra.gmra.mxu0 %vm132_vm1, %v416_v60 }
 0x3a4   :  { %2162 = vmatpush3.bf16.msra.mxu0 %v2334_v59  ;;  %2163 = vmatprep.mubr.msk.bf16.mxu0 %vm2549_vm0, %v2548_v0 }
 0x3a5   :  { %2173 = vmatprep.subr.bf16.mxu0 %v2548_v0 }
 0x3ab   :  { %2164 = vmatmul.mubr.msk.bf16.vlgmr.msra.gmra.mxu0 %vm132_vm1, %v416_v60 }
 0x3ac   :  { %2174 = vmatpush3.bf16.msra.mxu0 %v2336_v61  ;;  %2175 = vmatprep.mubr.msk.bf16.mxu0 %vm2549_vm0, %v2548_v0 }
 0x3ad   :  { %2187 = vmatprep.subr.bf16.mxu0 %v2548_v0 }
 0x3dd   :  { %v397_v3 = vpop.xlane.xlu1 %396 }
 0x3de   :  { %v398_v4 = vsub.f32 0.0, %v397_v3 }
 0x3e0   :  { %v405_v5 = vrot.slane %v398_v4, %v2743_v2 }
 0x3e2   :  { %408 = vst.msk [vmem:[#allocation12] sm:$0x1] %vm407_vm3, %v405_v5 }
 0x463   :  { %v460_v11 = vpop.f32.mrf.mxu0 }
 0x464   :  { %v507_v12 = vadd.f32 %v506_v55, %v460_v11 }
 0x465   :  { %v2153_v13 = vpop.f32.mrf.mxu0 }
 0x466   :  { %v608_v14 = vpack.c.bf16 %v507_v12, %v507_v12 }
 0x467   :  { %v463_v15 = vpop.f32.mrf.mxu0 }
 0x468   :  { %2176 = vmatmul.mubr.msk.bf16.vlgmr.msra.gmra.mxu0 %vm132_vm1, %v608_v14  ;;  %v2346_v15 = vld [vmem:[#allocation10 + $0x8] sm:$0xff]  }
 0x469   :  { %v2154_v16 = vpop.f32.mrf.mxu0  ;;  %2191 = vmatprep.mubr.msk.bf16.mxu0 %vm2549_vm0, %v2548_v0  ;;  %2188 = vmatpush3.bf16.msra.mxu0 %v2339_v22 }
 0x46a   :  { %2189 = vmatprep.subr.bf16.mxu0 %v2548_v0 }
 0x46b   :  { %v2756_v17 = vpop.f32.mrf.mxu0 }
 0x46c   :  { %v603_v9 = vadd.f32 %v2747_v6, %v2756_v17  ;;  %v2347_v6 = vld [vmem:[%s2949_s1 + $0x10] sm:$0xff]   ;;  %v2348_v17 = vld [vmem:[%s2951_s3 + $0x28] sm:$0xff]  }
 0x46d   :  { %v2165_v18 = vpop.f32.mrf.mxu0  ;;  %2190 = vmatpush3.bf16.msra.mxu0 %v2341_v32  ;;  %v2349_v32 = vld [vmem:[%s2951_s3 + $0x20] sm:$0xff]  }
 0x46e   :  { %2203 = vmatprep.subr.bf16.mxu0 %v2548_v0 }
 0x46f   :  { %v559_v19 = vpop.f32.mrf.mxu0 }
 0x471   :  { %v2166_v20 = vpop.f32.mrf.mxu0 }
 0x528   :  { %v663_v24 = vpop.f32.mrf.mxu0 }
 0x529   :  { %v664_v25 = vadd.f32 %v1935_v23, %v663_v24 }
 0x52a   :  { %v2177_v26 = vpop.f32.mrf.mxu0 }
 0x52b   :  { %v669_v27 = vmax.f32 %v664_v25, 0.0 }
 0x52c   :  { %v666_v28 = vpop.f32.mrf.mxu0 }
 0x52d   :  { %v670_v29 = vpack.c.bf16 %v669_v27, %v669_v27 }
 0x52e   :  { %v2178_v30 = vpop.f32.mrf.mxu0 }
 0x52f   :  { %2184 = vmatmul.mubr.msk.bf16.vlgmr.msra.gmra.mxu1 %vm201_vm2, %v670_v29 }
 0x530   :  { %2199 = vmatprep.mubr.msk.bf16.mxu1 %vm2549_vm0, %v2548_v0  ;;  %2196 = vmatpush3.bf16.msra.mxu1 %v2340_v31 }
 0x531   :  { %2197 = vmatprep.subr.bf16.mxu1 %v2548_v0 }
 0x534   :  { %2198 = vmatpush3.bf16.msra.mxu1 %v2342_v33  ;;  %v2350_v33 = vld [vmem:[%s2953_s5 + $0x28] sm:$0xff]  }
 0x535   :  { %2209 = vmatprep.subr.bf16.mxu1 %v2548_v0 }
 0x5ef   :  { %v733_v35 = vpop.f32.mrf.mxu1 }
 0x5f0   :  { %v734_v36 = vadd.f32 %v1942_v34, %v733_v35  ;;  %v1979_v34 = vld [vmem:[#allocation5 + $0x2] ss:$0 sm:$0xff] }
 0x5f1   :  { %v2185_v37 = vpop.f32.mrf.mxu1 }
 0x5f2   :  { %v739_v38 = vmax.f32 %v734_v36, 0.0 }
 0x5f3   :  { %v736_v39 = vpop.f32.mrf.mxu1 }
 0x5f4   :  { %v740_v41 = vpack.c.bf16 %v739_v38, %v739_v38 }
 0x5f5   :  { %v2186_v42 = vpop.f32.mrf.mxu1 }
 0x5f6   :  { %2192 = vmatmul.mubr.msk.bf16.vlgmr.msra.gmra.mxu0 %vm201_vm2, %v740_v41  ;;  %2200 = vmatmul.mubr.msk.bf16.vlgmr.msra.gmra.mxu1 %vm201_vm2, %v740_v41  ;;  %v2351_v42 = vld [vmem:[%s2955_s7 + $0x28] sm:$0xff]  }
 0x5f7   :  { %2210 = vmatpush3.bf16.msra.mxu1 %v2343_v40  ;;  %2211 = vmatprep.mubr.msk.bf16.mxu1 %vm2549_vm0, %v2548_v0 }
 0x5f8   :  { %2221 = vmatprep.subr.bf16.mxu1 %v2548_v0  ;;  %2205 = vmatprep.mubr.msk.bf16.mxu0 %vm2549_vm0, %v2548_v0 }
 0x5f9   :  { %2204 = vmatpush3.bf16.msra.mxu0 %v2345_v44  ;;  %v2353_v44 = vld [vmem:[%s2955_s7 + $0x20] sm:$0xff]  }
 0x5fa   :  { %2215 = vmatprep.subr.bf16.mxu0 %v2548_v0 }
 0x5fe   :  { %2212 = vmatmul.mubr.msk.bf16.vlgmr.msra.gmra.mxu1 %vm132_vm1, %v608_v14 }
 0x5ff   :  { %2222 = vmatpush3.bf16.msra.mxu1 %v2344_v43  ;;  %2223 = vmatprep.mubr.msk.bf16.mxu1 %vm2549_vm0, %v2548_v0  ;;  %v2352_v43 = vld [vmem:[%s2953_s5 + $0x20] sm:$0xff]  }
 0x600   :  { %2233 = vmatprep.subr.bf16.mxu1 %v2548_v0 }
 0x606   :  { %2224 = vmatmul.mubr.msk.bf16.vlgmr.msra.gmra.mxu1 %vm132_vm1, %v608_v14 }
 0x607   :  { %2237 = vmatprep.mubr.msk.bf16.mxu1 %vm2549_vm0, %v2548_v0  ;;  %2234 = vmatpush3.bf16.msra.mxu1 %v2348_v17  ;;  %v2003_v17 = vld [vmem:[%s2956_s8 + $0x2] ss:$0 sm:$0xff] }
 0x608   :  { %2235 = vmatprep.subr.bf16.mxu1 %v2548_v0 }
 0x60b   :  { %2236 = vmatpush3.bf16.msra.mxu1 %v2349_v32 }
 0x60c   :  { %2249 = vmatprep.subr.bf16.mxu1 %v2548_v0 }
 0x6b6   :  { %v803_v46 = vpop.f32.mrf.mxu0  ;;  %v868_v47 = vpop.f32.mrf.mxu1 }
 0x6b7   :  { %v804_v48 = vadd.f32 %v1950_v45, %v803_v46  ;;  %v869_v8 = vadd.f32 %v1959_v7, %v868_v47  ;;  %v1986_v45 = vld [vmem:[#allocation7 + $0x2] ss:$0 sm:$0xff] }
 0x6b8   :  { %v2193_v49 = vpop.f32.mrf.mxu0  ;;  %v2201_v50 = vpop.f32.mrf.mxu1 }
 0x6b9   :  { %v874_v51 = vadd.f32 2.0, %v804_v48  ;;  %v881_v10 = vadd.f32 %v869_v8, %v603_v9 }
 0x6ba   :  { %v806_v52 = vpop.f32.mrf.mxu0  ;;  %v871_v53 = vpop.f32.mrf.mxu1 }
 0x6bb   :  { %v875_v54 = vsub.f32 0.0, %v874_v51  ;;  %v2354_v51 = vld [vmem:[%s2957_s9 + $0x10] sm:$0xff]  }
 0x6bc   :  { %v2194_v55 = vpop.f32.mrf.mxu0  ;;  %v2202_v56 = vpop.f32.mrf.mxu1 }
 0x6bd   :  { %v876_v57 = vmul.f32 1.442695, %v875_v54  ;;  %v2355_v54 = vld [vmem:[%s2959_s11 + $0x10] sm:$0xff]  }
 0x6be   :  { %v992_v58 = vpop.f32.mrf.mxu1  ;;  %v2356_v55 = vld [vmem:[%s2958_s10 + $0x10] sm:$0xff]  }
 0x6bf   :  { %2371 = vpow2.f32 %v876_v57  ;;  %v1994_v56 = vld [vmem:[#allocation8 + $0x2] ss:$0 sm:$0xff] }
 0x6c0   :  { %v2213_v59 = vpop.f32.mrf.mxu1 }
 0x6c2   :  { %v995_v60 = vpop.f32.mrf.mxu1 }
 0x6c4   :  { %v2214_v61 = vpop.f32.mrf.mxu1 }
 0x6c6   :  { %v2805_v62 = vpop.f32.mrf.mxu1 }
 0x6c8   :  { %v2225_v63 = vpop.f32.mrf.mxu1 }
 0x6ca   :  { %v1093_v1 = vpop.f32.mrf.mxu1 }
 0x6cc   :  { %v2372_v3 = vpop.eup %2371  ;;  %v2226_v4 = vpop.f32.mrf.mxu1 }
 0x6cd   :  { %v878_v5 = vadd.f32 1.0, %v2372_v3 }
 0x6cf   :  { %2373 = vrcp.f32 %v878_v5 }
 0x6d0   :  { %2375 = vlog2.f32 %v878_v5 }
 0x6dc   :  { %v2374_v11 = vpop.eup %2373 }
 0x6dd   :  { %v2376_v12 = vpop.eup %2375  ;;  %v882_v13 = vmul.f32 %v2374_v11, %v881_v10 }
 0x6de   :  { %v884_v14 = vmul.f32 0.6931472, %v2376_v12 }
 0x6df   :  { %v896_v16 = vpack.c.bf16 %v882_v13, %v882_v13 }
 0x6e0   :  { %v885_v18 = vsel %vm132_vm1, %v884_v14, 0.0 }
 0x6e1   :  { %886 = vadd.xlane.f32.xlu0 %v885_v18  ;;  %2206 = vmatmul.mubr.msk.bf16.vlgmr.msra.gmra.mxu0 %vm132_vm1, %v896_v16 }
 0x6e2   :  { %2216 = vmatpush3.bf16.msra.mxu0 %v2346_v15  ;;  %2217 = vmatprep.mubr.msk.bf16.mxu0 %vm2549_vm0, %v2548_v0 }
 0x6e3   :  { %2227 = vmatprep.subr.bf16.mxu0 %v2548_v0 }
 0x6e9   :  { %2218 = vmatmul.mubr.msk.bf16.vlgmr.msra.gmra.mxu0 %vm132_vm1, %v896_v16 }
 0x6ea   :  { %2229 = vmatprep.mubr.msk.bf16.mxu0 %vm2549_vm0, %v2548_v0  ;;  %2228 = vmatpush3.bf16.msra.mxu0 %v2347_v6 }
 0x6eb   :  { %2241 = vmatprep.subr.bf16.mxu0 %v2548_v0 }
 0x76a   :  { %v887_v19 = vpop.xlane.xlu0 %886 }
 0x76b   :  { %v888_v20 = vsub.f32 0.0, %v887_v19 }
 0x76d   :  { %v893_v21 = vrot.slane %v888_v20, %v2743_v2 }
 0x76f   :  { %895 = vst.msk [vmem:[#allocation12 + $0x1] sm:$0x1] %vm407_vm3, %v893_v21 }
 0x7a1   :  { %v946_v22 = vpop.f32.mrf.mxu0 }
 0x7a2   :  { %v993_v23 = vadd.f32 %v992_v58, %v946_v22 }
 0x7a3   :  { %v2207_v24 = vpop.f32.mrf.mxu0 }
 0x7a4   :  { %v1096_v25 = vpack.c.bf16 %v993_v23, %v993_v23 }
 0x7a5   :  { %v949_v26 = vpop.f32.mrf.mxu0 }
 0x7a6   :  { %2230 = vmatmul.mubr.msk.bf16.vlgmr.msra.gmra.mxu0 %vm132_vm1, %v1096_v25  ;;  %v2357_v26 = vld [vmem:[#allocation10 + $0x10] sm:$0xff]  }
 0x7a7   :  { %v2208_v27 = vpop.f32.mrf.mxu0  ;;  %2245 = vmatprep.mubr.msk.bf16.mxu0 %vm2549_vm0, %v2548_v0  ;;  %2242 = vmatpush3.bf16.msra.mxu0 %v2350_v33 }
 0x7a8   :  { %2243 = vmatprep.subr.bf16.mxu0 %v2548_v0 }
 0x7a9   :  { %v2833_v28 = vpop.f32.mrf.mxu0 }
 0x7aa   :  { %v1091_v20 = vadd.f32 %v2805_v62, %v2833_v28  ;;  %v2358_v62 = vld [vmem:[%s2949_s1 + $0x18] sm:$0xff]  }
 0x7ab   :  { %v2219_v29 = vpop.f32.mrf.mxu0  ;;  %2244 = vmatpush3.bf16.msra.mxu0 %v2352_v43  ;;  %v2359_v28 = vld [vmem:[%s2951_s3 + $0x38] sm:$0xff]   ;;  %v2360_v43 = vld [vmem:[%s2951_s3 + $0x30] sm:$0xff]  }
 0x7ac   :  { %2257 = vmatprep.subr.bf16.mxu0 %v2548_v0 }
 0x7ad   :  { %v1047_v30 = vpop.f32.mrf.mxu0 }
 0x7af   :  { %v2220_v31 = vpop.f32.mrf.mxu0 }
 0x866   :  { %v1151_v35 = vpop.f32.mrf.mxu0 }
 0x867   :  { %v1152_v36 = vadd.f32 %v1979_v34, %v1151_v35 }
 0x868   :  { %v2231_v37 = vpop.f32.mrf.mxu0 }
 0x869   :  { %v1157_v38 = vmax.f32 %v1152_v36, 0.0 }
 0x86a   :  { %v1154_v39 = vpop.f32.mrf.mxu0 }
 0x86b   :  { %v1158_v40 = vpack.c.bf16 %v1157_v38, %v1157_v38 }
 0x86c   :  { %v2232_v41 = vpop.f32.mrf.mxu0 }
 0x86d   :  { %2238 = vmatmul.mubr.msk.bf16.vlgmr.msra.gmra.mxu1 %vm201_vm2, %v1158_v40 }
 0x86e   :  { %2253 = vmatprep.mubr.msk.bf16.mxu1 %vm2549_vm0, %v2548_v0  ;;  %2250 = vmatpush3.bf16.msra.mxu1 %v2351_v42 }
 0x86f   :  { %2251 = vmatprep.subr.bf16.mxu1 %v2548_v0 }
 0x872   :  { %2252 = vmatpush3.bf16.msra.mxu1 %v2353_v44  ;;  %v2361_v44 = vld [vmem:[%s2953_s5 + $0x38] sm:$0xff]  }
 0x873   :  { %2263 = vmatprep.subr.bf16.mxu1 %v2548_v0 }
 0x92d   :  { %v1221_v46 = vpop.f32.mrf.mxu1 }
 0x92e   :  { %v1222_v47 = vadd.f32 %v1986_v45, %v1221_v46  ;;  %v2023_v45 = vld [vmem:[#allocation5 + $0x3] ss:$0 sm:$0xff] }
 0x92f   :  { %v2239_v48 = vpop.f32.mrf.mxu1 }
 0x930   :  { %v1227_v49 = vmax.f32 %v1222_v47, 0.0 }
 0x931   :  { %v1224_v50 = vpop.f32.mrf.mxu1 }
 0x932   :  { %v1228_v52 = vpack.c.bf16 %v1227_v49, %v1227_v49 }
 0x933   :  { %v2240_v53 = vpop.f32.mrf.mxu1 }
 0x934   :  { %2246 = vmatmul.mubr.msk.bf16.vlgmr.msra.gmra.mxu0 %vm201_vm2, %v1228_v52  ;;  %2254 = vmatmul.mubr.msk.bf16.vlgmr.msra.gmra.mxu1 %vm201_vm2, %v1228_v52  ;;  %v2362_v53 = vld [vmem:[%s2955_s7 + $0x38] sm:$0xff]  }
 0x935   :  { %2264 = vmatpush3.bf16.msra.mxu1 %v2354_v51  ;;  %2265 = vmatprep.mubr.msk.bf16.mxu1 %vm2549_vm0, %v2548_v0 }
 0x936   :  { %2275 = vmatprep.subr.bf16.mxu1 %v2548_v0  ;;  %2259 = vmatprep.mubr.msk.bf16.mxu0 %vm2549_vm0, %v2548_v0 }
 0x937   :  { %2258 = vmatpush3.bf16.msra.mxu0 %v2356_v55  ;;  %v2364_v55 = vld [vmem:[%s2955_s7 + $0x30] sm:$0xff]  }
 0x938   :  { %2269 = vmatprep.subr.bf16.mxu0 %v2548_v0 }
 0x93c   :  { %2266 = vmatmul.mubr.msk.bf16.vlgmr.msra.gmra.mxu1 %vm132_vm1, %v1096_v25 }
 0x93d   :  { %2276 = vmatpush3.bf16.msra.mxu1 %v2355_v54  ;;  %2277 = vmatprep.mubr.msk.bf16.mxu1 %vm2549_vm0, %v2548_v0  ;;  %v2363_v54 = vld [vmem:[%s2953_s5 + $0x30] sm:$0xff]  }
 0x93e   :  { %2287 = vmatprep.subr.bf16.mxu1 %v2548_v0 }
 0x944   :  { %2278 = vmatmul.mubr.msk.bf16.vlgmr.msra.gmra.mxu1 %vm132_vm1, %v1096_v25 }
 0x945   :  { %2291 = vmatprep.mubr.msk.bf16.mxu1 %vm2549_vm0, %v2548_v0  ;;  %2288 = vmatpush3.bf16.msra.mxu1 %v2359_v28 }
 0x946   :  { %2289 = vmatprep.subr.bf16.mxu1 %v2548_v0 }
 0x949   :  { %2290 = vmatpush3.bf16.msra.mxu1 %v2360_v43 }
 0x94a   :  { %2303 = vmatprep.subr.bf16.mxu1 %v2548_v0 }
 0x9f4   :  { %v1291_v57 = vpop.f32.mrf.mxu0  ;;  %v1356_v58 = vpop.f32.mrf.mxu1 }
 0x9f5   :  { %v1292_v59 = vadd.f32 %v1994_v56, %v1291_v57  ;;  %v1357_v19 = vadd.f32 %v2003_v17, %v1356_v58  ;;  %v2030_v56 = vld [vmem:[#allocation7 + $0x3] ss:$0 sm:$0xff]  ;;  %v2047_v17 = vld [vmem:[%s2956_s8 + $0x3] ss:$0 sm:$0xff]  ;;  %s2489_s8 = scalar_lea.vmem %s1886_s22, 128 }
 0x9f6   :  { %v2247_v60 = vpop.f32.mrf.mxu0  ;;  %v2255_v61 = vpop.f32.mrf.mxu1  ;;  %p2490_p11 = scmp.ne.s32.totalorder %s1886_s22, %s2489_s8  ;;  %p2495_p13 = scmp.lt.s32.totalorder %s2489_s8, %s2489_s8 }
 0x9f7   :  { %v1362_v63 = vadd.f32 2.0, %v1292_v59  ;;  %v1369_v21 = vadd.f32 %v1357_v19, %v1091_v20 }
 0x9f8   :  { %v1294_v1 = vpop.f32.mrf.mxu0  ;;  %v1359_v3 = vpop.f32.mrf.mxu1  ;;  %p2496_p0 = por %p2495_p13, %p2494_p12 }
 0x9f9   :  { %v1363_v4 = vsub.f32 0.0, %v1362_v63 }
 0x9fa   :  { %v2248_v5 = vpop.f32.mrf.mxu0  ;;  %v2256_v7 = vpop.f32.mrf.mxu1  ;;  %p2497_p1 = pnand %p2496_p0, %p2490_p11 }
 0x9fb   :  { %v1364_v8 = vmul.f32 1.442695, %v1363_v4 }
 0x9fc   :  { %v1480_v9 = vpop.f32.mrf.mxu1 }
 0x9fd   :  { %2377 = vpow2.f32 %v1364_v8 }
 0x9fe   :  { %v2267_v10 = vpop.f32.mrf.mxu1 }
 0xa00   :  { %v1483_v11 = vpop.f32.mrf.mxu1 }
 0xa02   :  { %v2268_v12 = vpop.f32.mrf.mxu1 }
 0xa04   :  { %v2882_v13 = vpop.f32.mrf.mxu1 }
 0xa06   :  { %v2279_v14 = vpop.f32.mrf.mxu1 }
 0xa08   :  { %v1581_v15 = vpop.f32.mrf.mxu1 }
 0xa0a   :  { %v2378_v16 = vpop.eup %2377  ;;  %v2280_v18 = vpop.f32.mrf.mxu1 }
 0xa0b   :  { %v1366_v6 = vadd.f32 1.0, %v2378_v16 }
 0xa0d   :  { %2379 = vrcp.f32 %v1366_v6 }
 0xa0e   :  { %2381 = vlog2.f32 %v1366_v6 }
 0xa1a   :  { %v2380_v22 = vpop.eup %2379 }
 0xa1b   :  { %v2382_v23 = vpop.eup %2381  ;;  %v1370_v24 = vmul.f32 %v2380_v22, %v1369_v21 }
 0xa1c   :  { %v1372_v25 = vmul.f32 0.6931472, %v2382_v23 }
 0xa1d   :  { %v1384_v27 = vpack.c.bf16 %v1370_v24, %v1370_v24 }
 0xa1e   :  { %v1373_v29 = vsel %vm132_vm1, %v1372_v25, 0.0 }
 0xa1f   :  { %1374 = vadd.xlane.f32.xlu0 %v1373_v29  ;;  %2260 = vmatmul.mubr.msk.bf16.vlgmr.msra.gmra.mxu0 %vm132_vm1, %v1384_v27 }
 0xa20   :  { %2270 = vmatpush3.bf16.msra.mxu0 %v2357_v26  ;;  %2271 = vmatprep.mubr.msk.bf16.mxu0 %vm2549_vm0, %v2548_v0 }
 0xa21   :  { %2281 = vmatprep.subr.bf16.mxu0 %v2548_v0 }
 0xa27   :  { %2272 = vmatmul.mubr.msk.bf16.vlgmr.msra.gmra.mxu0 %vm132_vm1, %v1384_v27 }
 0xa28   :  { %2283 = vmatprep.mubr.msk.bf16.mxu0 %vm2549_vm0, %v2548_v0  ;;  %2282 = vmatpush3.bf16.msra.mxu0 %v2358_v62 }
 0xa29   :  { %2295 = vmatprep.subr.bf16.mxu0 %v2548_v0 }
 0xaa8   :  { %v1375_v30 = vpop.xlane.xlu0 %1374 }
 0xaa9   :  { %v1376_v31 = vsub.f32 0.0, %v1375_v30 }
 0xaab   :  { %v1381_v32 = vrot.slane %v1376_v31, %v2743_v2 }
 0xaad   :  { %1383 = vst.msk [vmem:[#allocation12 + $0x2] sm:$0x1] %vm407_vm3, %v1381_v32 }
 0xadf   :  { %v1434_v33 = vpop.f32.mrf.mxu0 }
 0xae0   :  { %v1481_v34 = vadd.f32 %v1480_v9, %v1434_v33 }
 0xae1   :  { %v2261_v35 = vpop.f32.mrf.mxu0 }
 0xae2   :  { %v1584_v36 = vpack.c.bf16 %v1481_v34, %v1481_v34  ;;  %1872 = vst.msk [vmem:[#allocation11] sm:$0xff] %vm132_vm1, %v1481_v34 }
 0xae3   :  { %v1437_v37 = vpop.f32.mrf.mxu0 }
 0xae4   :  { %2284 = vmatmul.mubr.msk.bf16.vlgmr.msra.gmra.mxu0 %vm132_vm1, %v1584_v36 }
 0xae5   :  { %v2262_v38 = vpop.f32.mrf.mxu0  ;;  %2299 = vmatprep.mubr.msk.bf16.mxu0 %vm2549_vm0, %v2548_v0  ;;  %2296 = vmatpush3.bf16.msra.mxu0 %v2361_v44 }
 0xae6   :  { %2297 = vmatprep.subr.bf16.mxu0 %v2548_v0 }
 0xae7   :  { %v1532_v39 = vpop.f32.mrf.mxu0 }
 0xae8   :  { %v1579_v20 = vadd.f32 %v2882_v13, %v1532_v39 }
 0xae9   :  { %v2273_v40 = vpop.f32.mrf.mxu0  ;;  %2298 = vmatpush3.bf16.msra.mxu0 %v2363_v54 }
 0xaeb   :  { %v1535_v41 = vpop.f32.mrf.mxu0 }
 0xaed   :  { %v2274_v42 = vpop.f32.mrf.mxu0 }
 0xba4   :  { %v1639_v46 = vpop.f32.mrf.mxu0 }
 0xba5   :  { %v1640_v47 = vadd.f32 %v2023_v45, %v1639_v46 }
 0xba6   :  { %v2285_v48 = vpop.f32.mrf.mxu0 }
 0xba7   :  { %v1645_v49 = vmax.f32 %v1640_v47, 0.0 }
 0xba8   :  { %v1642_v50 = vpop.f32.mrf.mxu0 }
 0xba9   :  { %v1646_v51 = vpack.c.bf16 %v1645_v49, %v1645_v49 }
 0xbaa   :  { %v2286_v52 = vpop.f32.mrf.mxu0 }
 0xbab   :  { %2292 = vmatmul.mubr.msk.bf16.vlgmr.msra.gmra.mxu1 %vm201_vm2, %v1646_v51 }
 0xbac   :  { %2307 = vmatprep.mubr.msk.bf16.mxu1 %vm2549_vm0, %v2548_v0  ;;  %2304 = vmatpush3.bf16.msra.mxu1 %v2362_v53 }
 0xbad   :  { %2305 = vmatprep.subr.bf16.mxu1 %v2548_v0  ;;  %v2038_v0 = vld [vmem:[#allocation8 + $0x3] ss:$0 sm:$0xff] }
 0xbb0   :  { %2306 = vmatpush3.bf16.msra.mxu1 %v2364_v55 }
 0xc6b   :  { %v1709_v57 = vpop.f32.mrf.mxu1 }
 0xc6c   :  { %v1710_v58 = vadd.f32 %v2030_v56, %v1709_v57 }
 0xc6d   :  { %v2293_v59 = vpop.f32.mrf.mxu1 }
 0xc6e   :  { %v1715_v60 = vmax.f32 %v1710_v58, 0.0 }
 0xc6f   :  { %v1712_v61 = vpop.f32.mrf.mxu1 }
 0xc70   :  { %v1716_v63 = vpack.c.bf16 %v1715_v60, %v1715_v60 }
 0xc71   :  { %v2294_v1 = vpop.f32.mrf.mxu1 }
 0xc72   :  { %2300 = vmatmul.mubr.msk.bf16.vlgmr.msra.gmra.mxu0 %vm201_vm2, %v1716_v63  ;;  %2308 = vmatmul.mubr.msk.bf16.vlgmr.msra.gmra.mxu1 %vm201_vm2, %v1716_v63 }
 0xd32   :  { %v1779_v3 = vpop.f32.mrf.mxu0  ;;  %v1844_v4 = vpop.f32.mrf.mxu1 }
 0xd33   :  { %v1780_v5 = vadd.f32 %v2038_v0, %v1779_v3  ;;  %v1845_v19 = vadd.f32 %v2047_v17, %v1844_v4 }
 0xd34   :  { %v2301_v7 = vpop.f32.mrf.mxu0  ;;  %v2309_v8 = vpop.f32.mrf.mxu1 }
 0xd35   :  { %v1850_v9 = vadd.f32 2.0, %v1780_v5  ;;  %v1857_v21 = vadd.f32 %v1845_v19, %v1579_v20 }
 0xd36   :  { %v1782_v10 = vpop.f32.mrf.mxu0  ;;  %v1847_v11 = vpop.f32.mrf.mxu1 }
 0xd37   :  { %v1851_v12 = vsub.f32 0.0, %v1850_v9 }
 0xd38   :  { %v2302_v14 = vpop.f32.mrf.mxu0  ;;  %v2310_v15 = vpop.f32.mrf.mxu1 }
 0xd39   :  { %v1852_v16 = vmul.f32 1.442695, %v1851_v12 }
 0xd3b   :  { %2383 = vpow2.f32 %v1852_v16 }
 0xd48   :  { %v2384_v18 = vpop.eup %2383 }
 0xd49   :  { %v1854_v6 = vadd.f32 1.0, %v2384_v18 }
 0xd4b   :  { %2385 = vrcp.f32 %v1854_v6 }
 0xd4c   :  { %2387 = vlog2.f32 %v1854_v6 }
 0xd58   :  { %v2386_v22 = vpop.eup %2385 }
 0xd59   :  { %v2388_v23 = vpop.eup %2387  ;;  %v1858_v24 = vmul.f32 %v2386_v22, %v1857_v21 }
 0xd5a   :  { %v1860_v25 = vmul.f32 0.6931472, %v2388_v23 }
 0xd5b   :  { %1874 = vrot.lane.b32.xlu0 %v1858_v24, %s2540_s16 }
 0xd5c   :  { %v1861_v26 = vsel %vm132_vm1, %v1860_v25, 0.0 }
 0xd5d   :  { %1862 = vadd.xlane.f32.xlu1 %v1861_v26 }
 0xdcd   :  { %v1875_v27 = vpop.permute.xlu0 %1874 }
 0xdce   :  { %1878 = vst.msk [vmem:[#allocation11] sm:$0xff] %vm1877_vm4, %v1875_v27 }
 0xdcf   :  { %2500 = shalt.err (!%p2497_p1)
}
 0xdd0   :  { %1888 = dma.vmem_to_hbm [thread:$0]  %s1886_s22, 128, %s2961_s13, [#allocation4]  }
 0xdd1   :  { %s2552_s16 = smov [#allocation12]  }
 0xdd2   :  { %s1895_s4 = sshll.u32 %s2552_s16, 4  ;;  %s1896_s4 = int_to_ptr.vmem [resolvable:$true] %s1895_s4 }
 0xdd3   :  { %s2509_s12 = scalar_lea.vmem %s1896_s4, 64  ;;  %p2514_p3 = scmp.lt.s32.totalorder %s1896_s4, %s1896_s4 }
 0xdd4   :  { %p2510_p2 = scmp.ne.s32.totalorder %s1896_s4, %s2509_s12  ;;  %p2515_p4 = scmp.lt.s32.totalorder %s2509_s12, %s2509_s12 }
 0xdd6   :  { %p2516_p5 = por %p2515_p4, %p2514_p3 }
 0xdd8   :  { %p2517_p6 = pnand %p2516_p5, %p2510_p2 }
 0xde6   :  { %v1863_v13 = vpop.xlane.xlu1 %1862 }
 0xde7   :  { %v1864_v29 = vsub.f32 0.0, %v1863_v13 }
 0xde9   :  { %v1869_v62 = vrot.slane %v1864_v29, %v2743_v2 }
 0xdeb   :  { %1871 = vst.msk [vmem:[#allocation12 + $0x3] sm:$0x1] %vm407_vm3, %v1869_v62 }
 0xdec   :  { %2520 = shalt.err (!%p2517_p6)
}
 0xded   :  { %1898 = dma.vmem_to_hbm [thread:$0]  %s1896_s4, 64, %s2962_s14, [#allocation13]  }
 0xdee   :  { %2535 = dma.done.wait [#allocation4], 128  }
 0xdef   :  { %2536 = vsyncadd [#allocation4], 4294967168 }
 0xdf0   :  { %2537 = dma.done.wait [#allocation13], 64  }
 0xdf1   :  { %2538 = vsyncadd [#allocation13], 4294967232 }
 0xdf2   :  { %1905 = vsyncpa [#allocation3], 1 }
 0xdf3   :  { %1906 = vsyncpa [#allocation6], 1 }
 0xdf4   :  { %1907 = vsyncpa [#allocation9], 1 }
 0xdf5   :  { %1908 = vsyncpa [#allocation4], 1 }
 0xdf6   :  { %1909 = vsyncpa [#allocation13], 1 }

</bundles_post_ra>
